<compile_context>
chip_gen: v7x
topology: tpu7x:2x2x1
jax: 0.10.0
libtpu: 0.0.40
codegen_flags: <defaults>
</compile_context>

<pallas_src>
import functools

import jax
import jax.numpy as jnp
from jax.experimental import pallas as pl
from jax.experimental.pallas import tpu as pltpu

LANE = 128


def _round_up(x, m):
    return ((x + m - 1) // m) * m


# ----------------------------- Pallas kernels ------------------------------

def _conv_pool_kernel(x_ref, w_ref, sb_ref, o_ref, *, m_rows, wp, cp):
    """Fused Conv2d(3x3, s=2, p=1) + BN(eval) + ReLU + MaxPool2d(2) for one image.

    x_ref : (1, 16, FP, Cin) bf16 -- 4x4 stride-phase split of the padded image,
                                     spatial flattened per phase (flat pitch = wp)
    w_ref : (9, Cin, cp)     bf16 -- per-tap weight matrices, tap index = 3*kh+kw
    sb_ref: (2, cp)          f32  -- row 0 = folded BN scale, row 1 = folded bias
    o_ref : (1, m_rows, cp)  bf16 -- pooled output, flat pitch wp (col wp-1 is scratch)
    """
    scale = sb_ref[0:1, :]
    bias = sb_ref[1:2, :]
    pooled = None
    for f in range(2):                      # pre-pool output row parity
        for e in range(2):                  # pre-pool output col parity
            acc = jnp.zeros((m_rows, cp), jnp.float32)
            for kh in range(3):
                for kw in range(3):
                    r, dr = (2 * f + kh) % 4, (2 * f + kh) // 4
                    s, dc = (2 * e + kw) % 4, (2 * e + kw) // 4
                    off = dr * wp + dc
                    acc = acc + jnp.dot(
                        x_ref[0, 4 * r + s, off:off + m_rows, :],
                        w_ref[3 * kh + kw],
                        preferred_element_type=jnp.float32)
            act = jnp.maximum(acc * scale + bias, 0.0)
            pooled = act if pooled is None else jnp.maximum(pooled, act)
    o_ref[0, :, :] = pooled.astype(o_ref.dtype)


def _conv_kernel(x_ref, w_ref, sb_ref, o_ref, *, m_rows, wp, cp):
    """Fused Conv2d(3x3, s=2, p=1) + BN(eval) + ReLU (no pool) for one image.

    x_ref : (1, 4, FP, Cin) bf16 -- 2x2 stride-phase split, flattened per phase.
    """
    acc = jnp.zeros((m_rows, cp), jnp.float32)
    for kh in range(3):
        for kw in range(3):
            off = (kh // 2) * wp + (kw // 2)
            acc = acc + jnp.dot(
                x_ref[0, 2 * (kh % 2) + (kw % 2), off:off + m_rows, :],
                w_ref[3 * kh + kw],
                preferred_element_type=jnp.float32)
    act = jnp.maximum(acc * sb_ref[0:1, :] + sb_ref[1:2, :], 0.0)
    o_ref[0, :, :] = act.astype(o_ref.dtype)


# ------------------------------- JAX glue ----------------------------------

def _phase_split(x_nhwc, phase, hp, wp):
    """Pad (top/left=1) and split H, W into `phase` stride-phases; flatten spatial.

    Returns (N, phase*phase, hp*wp, C) with
      out[n, r*phase + s, i*wp + j, c] == padded_x[n, phase*i + r, phase*j + s, c].
    """
    N, H, W, C = x_nhwc.shape
    hpad, wpad = phase * hp, phase * wp
    xp = jnp.pad(x_nhwc, ((0, 0), (1, hpad - H - 1), (1, wpad - W - 1), (0, 0)))
    xp = xp.reshape(N, hp, phase, wp, phase, C)
    xp = jnp.transpose(xp, (0, 2, 4, 1, 3, 5))
    return xp.reshape(N, phase * phase, hp * wp, C)


def _phase_conv_call(kernel_fn, xph, w_taps, scale_bias, *, m_rows, dots_per_row,
                     out_dtype=jnp.bfloat16):
    N, n_phase, FP, C = xph.shape
    taps, _, Cp = w_taps.shape

    # Explicit VMEM budget (double-buffered streamed blocks + resident operands
    # + live f32 accumulators), floored at 32 MiB, kept under v7x's 64 MiB physical.
    x_blk = n_phase * FP * C * xph.dtype.itemsize
    o_blk = m_rows * Cp * jnp.dtype(out_dtype).itemsize
    w_bytes = taps * C * Cp * w_taps.dtype.itemsize
    sb_bytes = 2 * Cp * 4
    acc_bytes = 2 * m_rows * Cp * 4
    vmem_est = 2 * x_blk + 2 * o_blk + w_bytes + sb_bytes + acc_bytes
    vmem_limit = int(min(max(4 * vmem_est, 32 << 20), 60 << 20))

    flops = 2 * N * dots_per_row * m_rows * C * Cp
    bytes_accessed = N * (x_blk + o_blk) + w_bytes + sb_bytes

    return pl.pallas_call(
        kernel_fn,
        out_shape=jax.ShapeDtypeStruct((N, m_rows, Cp), out_dtype),
        grid=(N,),
        in_specs=[
            pl.BlockSpec((1, n_phase, FP, C), lambda n: (n, 0, 0, 0)),
            pl.BlockSpec((taps, C, Cp), lambda n: (0, 0, 0),
                         pipeline_mode=pl.Buffered(1)),       # resident weights
            pl.BlockSpec((2, Cp), lambda n: (0, 0),
                         pipeline_mode=pl.Buffered(1)),       # resident scale/bias
        ],
        out_specs=pl.BlockSpec((1, m_rows, Cp), lambda n: (n, 0, 0)),
        compiler_params=pltpu.CompilerParams(
            dimension_semantics=("parallel",),
            vmem_limit_bytes=vmem_limit),
        cost_estimate=pl.CostEstimate(flops=flops, transcendentals=0,
                                      bytes_accessed=bytes_accessed),
    )(xph, w_taps, scale_bias)


def conv1_bn_relu_pool(x_nhwc, w_taps, scale_bias):
    """Conv2d(k=3,p=1,s=2) + BN(eval) + ReLU + MaxPool2d(2), fully fused."""
    N, H, W, _ = x_nhwc.shape
    if H % 4 or W % 4:
        # TODO(synk): PyTorch's floor behaviour for odd conv/pool sizes not implemented.
        raise ValueError("conv1_bn_relu_pool requires H, W divisible by 4")
    POH, POW = H // 4, W // 4                     # pooled output spatial dims
    hp4, wp4 = POH + 2, POW + 1                   # per-phase (rows, flat pitch)
    xph = _phase_split(x_nhwc, 4, hp4, wp4)       # (N, 16, hp4*wp4, Cin)
    m_rows = POH * wp4
    kernel = functools.partial(_conv_pool_kernel, m_rows=m_rows, wp=wp4,
                               cp=w_taps.shape[-1])
    out = _phase_conv_call(kernel, xph, w_taps, scale_bias,
                           m_rows=m_rows, dots_per_row=36)
    # flat (pitch wp4, last column is scratch) -> (N, POH, POW, Cp); the slice is
    # fused by XLA into the next stage's phase-split / final strip.
    return out.reshape(N, POH, wp4, -1)[:, :, :POW, :]


def conv2_bn_relu(x_nhwc, w_taps, scale_bias):
    """Conv2d(k=3,p=1,s=2) + BN(eval) + ReLU (no pool)."""
    N, Hi, Wi, _ = x_nhwc.shape
    Ho, Wo = (Hi + 1) // 2, (Wi + 1) // 2
    hp2, wp2 = Ho + 2, Wo + 1
    xph = _phase_split(x_nhwc, 2, hp2, wp2)       # (N, 4, hp2*wp2, Cin)
    m_rows = Ho * wp2
    kernel = functools.partial(_conv_kernel, m_rows=m_rows, wp=wp2,
                               cp=w_taps.shape[-1])
    out = _phase_conv_call(kernel, xph, w_taps, scale_bias,
                           m_rows=m_rows, dots_per_row=9)
    return out.reshape(N, Ho, wp2, -1)[:, :, :Wo, :]


# ---------------------------- parameter setup ------------------------------

def _fold_bn(conv_b, gamma, beta, mean, var, eps=1e-5):
    scale = gamma / jnp.sqrt(var + eps)
    bias = scale * (conv_b - mean) + beta
    return scale, bias


def _conv_w_to_taps(w_oihw, cin_pad, cout_pad):
    """[Cout,Cin,KH,KW] -> (KH*KW, cin_pad, cout_pad) per-tap matrices (tap=3*kh+kw)."""
    co, ci, kh, kw = w_oihw.shape
    w = jnp.transpose(w_oihw, (2, 3, 1, 0)).reshape(kh * kw, ci, co)
    return jnp.pad(w, ((0, 0), (0, cin_pad - ci), (0, cout_pad - co)))


def _pad_vec(v, n):
    return jnp.pad(v, (0, n - v.shape[0]))


def init_protonet_raw_params(key, base_width):
    c_in, c_mid, c_out = base_width * 8, base_width * 4, base_width * 2
    ks = jax.random.split(key, 12)

    def conv_w(k, co, ci):  # PyTorch layout [Cout, Cin, KH, KW]
        return 0.1 * jax.random.normal(k, (co, ci, 3, 3), jnp.float32)

    return {
        "w1": conv_w(ks[0], c_mid, c_in),
        "b1": 0.1 * jax.random.normal(ks[1], (c_mid,), jnp.float32),
        "g1": 1.0 + 0.1 * jax.random.normal(ks[2], (c_mid,), jnp.float32),
        "be1": 0.1 * jax.random.normal(ks[3], (c_mid,), jnp.float32),
        "m1": 0.1 * jax.random.normal(ks[4], (c_mid,), jnp.float32),
        "v1": jnp.abs(jax.random.normal(ks[5], (c_mid,), jnp.float32)) + 0.5,
        "w2": conv_w(ks[6], c_out, c_mid),
        "b2": 0.1 * jax.random.normal(ks[7], (c_out,), jnp.float32),
        "g2": 1.0 + 0.1 * jax.random.normal(ks[8], (c_out,), jnp.float32),
        "be2": 0.1 * jax.random.normal(ks[9], (c_out,), jnp.float32),
        "m2": 0.1 * jax.random.normal(ks[10], (c_out,), jnp.float32),
        "v2": jnp.abs(jax.random.normal(ks[11], (c_out,), jnp.float32)) + 0.5,
    }


def prepare_params(raw):
    c_mid, c_in = raw["w1"].shape[0], raw["w1"].shape[1]
    c_out = raw["w2"].shape[0]
    c_mid_p = _round_up(c_mid, LANE)   # lane-pad Cout to 128 (don't over-pad to 256)
    c_out_p = _round_up(c_out, LANE)

    s1, bb1 = _fold_bn(raw["b1"], raw["g1"], raw["be1"], raw["m1"], raw["v1"])
    s2, bb2 = _fold_bn(raw["b2"], raw["g2"], raw["be2"], raw["m2"], raw["v2"])

    return {
        # conv1: real Cin, output channels lane-padded to 128 (zero columns)
        "w1_taps": _conv_w_to_taps(raw["w1"], c_in, c_mid_p).astype(jnp.bfloat16),
        "sb1": jnp.stack([_pad_vec(s1, c_mid_p), _pad_vec(bb1, c_mid_p)]),
        # conv2: consumes the 128-channel (lane-padded) pooled activation;
        # padded input rows / output columns of w2 are zero
        "w2_taps": _conv_w_to_taps(raw["w2"], c_mid_p, c_out_p).astype(jnp.bfloat16),
        "sb2": jnp.stack([_pad_vec(s2, c_out_p), _pad_vec(bb2, c_out_p)]),
    }


# ------------------------------- forward -----------------------------------

def protonet_forward(params, x_nchw, *, cout2):
    # encoder = identity  (injected sub-module in the PyTorch reference)
    x = jnp.transpose(x_nchw, (0, 2, 3, 1)).astype(jnp.bfloat16)     # NCHW -> NHWC
    h1 = conv1_bn_relu_pool(x, params["w1_taps"], params["sb1"])     # (N, H/4, W/4, 128)
    h2 = conv2_bn_relu(h1, params["w2_taps"], params["sb2"])         # (N, H/8, W/8, 128)
    h2 = h2[..., :cout2]                          # strip lane padding (bf16, tiny)
    h2 = jnp.transpose(h2, (0, 3, 1, 2))          # NHWC -> NCHW: match torch Flatten order
    return h2.reshape(h2.shape[0], -1).astype(jnp.float32)


# --------------------------- pure-JAX reference ----------------------------

def protonet_reference(raw, x_nchw, eps=1e-5):
    def conv(x, w, b):
        y = jax.lax.conv_general_dilated(
            x, w, window_strides=(2, 2), padding=((1, 1), (1, 1)),
            dimension_numbers=("NCHW", "OIHW", "NCHW"))
        return y + b[None, :, None, None]

    def bn(x, g, be, m, v):
        return ((x - m[None, :, None, None]) / jnp.sqrt(v[None, :, None, None] + eps)
                * g[None, :, None, None] + be[None, :, None, None])

    h = jax.nn.relu(bn(conv(x_nchw, raw["w1"], raw["b1"]),
                       raw["g1"], raw["be1"], raw["m1"], raw["v1"]))
    h = jax.lax.reduce_window(h, -jnp.inf, jax.lax.max,
                              (1, 1, 2, 2), (1, 1, 2, 2), "VALID")
    h = jax.nn.relu(bn(conv(h, raw["w2"], raw["b2"]),
                       raw["g2"], raw["be2"], raw["m2"], raw["v2"]))
    return h.reshape(h.shape[0], -1)


if __name__ == "__main__":
    base_width = 4            # classifier channels 32 -> 16 -> 8 (small test size)
    N, H, W = 2, 16, 16
    key = jax.random.PRNGKey(0)
    k_param, k_x = jax.random.split(key)

    raw = init_protonet_raw_params(k_param, base_width)
    params = prepare_params(raw)
    x = jax.random.normal(k_x, (N, base_width * 8, H, W), jnp.float32)  # NCHW

    fwd = jax.jit(functools.partial(protonet_forward, cout2=base_width * 2))
    out = jax.block_until_ready(fwd(params, x))

    # expected: 16x16 --conv s2--> 8x8 --maxpool2--> 4x4 --conv s2--> 2x2
    assert out.shape == (N, (base_width * 2) * (H // 8) * (W // 8)), out.shape
    assert bool(jnp.all(jnp.isfinite(out)))

    # loose check vs. the f32 reference (kernel path uses bf16 inputs/weights)
    ref = protonet_reference(raw, x)
    err = float(jnp.max(jnp.abs(out - ref)))
    ref_scale = float(jnp.max(jnp.abs(ref)))
    assert err <= 1e-1 * max(1.0, ref_scale), (err, ref_scale)

    print("KERNEL_OK")
</pallas_src>

<mosaic_0001>
module attributes {stable_mosaic.version = 11 : i64} {
  func.func @_conv_pool_kernel(%arg0: i32, %arg1: memref<1x16x30x32xbf16, #tpu.memory_space<vmem>>, %arg2: memref<9x32x128xbf16, #tpu.memory_space<vmem>>, %arg3: memref<2x128xf32, #tpu.memory_space<vmem>>, %arg4: memref<1x20x128xbf16, #tpu.memory_space<vmem>>) attributes {dimension_semantics = [#tpu.dimension_semantics<parallel>], iteration_bounds = array<i64: 2>, scalar_prefetch = 0 : i64, scratch_operands = 0 : i64, tpu.core_type = #tpu.core_type<tc>, window_params = [{transform_indices = @transform_0, window_bounds = array<i64: 1, 16, 30, 32>}, {pipeline_mode = #tpu.pipeline_mode<synchronous>, transform_indices = @transform_1, window_bounds = array<i64: 9, 32, 128>}, {pipeline_mode = #tpu.pipeline_mode<synchronous>, transform_indices = @transform_2, window_bounds = array<i64: 2, 128>}, {transform_indices = @transform_3, window_bounds = array<i64: 1, 20, 128>}]} {
    %c0 = arith.constant 0 : index
    %c0_0 = arith.constant 0 : index
    %0 = vector.load %arg3[%c0, %c0_0] : memref<2x128xf32, #tpu.memory_space<vmem>>, vector<1x128xf32>
    %c1 = arith.constant 1 : index
    %c0_1 = arith.constant 0 : index
    %1 = vector.load %arg3[%c1, %c0_1] : memref<2x128xf32, #tpu.memory_space<vmem>>, vector<1x128xf32>
    %cst = arith.constant 0.000000e+00 : f32
    %2 = vector.broadcast %cst : f32 to vector<20x128xf32>
    %c0_2 = arith.constant 0 : index
    %c0_3 = arith.constant 0 : index
    %c0_4 = arith.constant 0 : index
    %c0_5 = arith.constant 0 : index
    %3 = vector.load %arg1[%c0_2, %c0_3, %c0_4, %c0_5] : memref<1x16x30x32xbf16, #tpu.memory_space<vmem>>, vector<1x1x20x32xbf16>
    %4 = vector.shape_cast %3 : vector<1x1x20x32xbf16> to vector<20x32xbf16>
    %c0_6 = arith.constant 0 : index
    %c0_7 = arith.constant 0 : index
    %c0_8 = arith.constant 0 : index
    %5 = vector.load %arg2[%c0_6, %c0_7, %c0_8] : memref<9x32x128xbf16, #tpu.memory_space<vmem>>, vector<1x32x128xbf16>
    %6 = vector.shape_cast %5 : vector<1x32x128xbf16> to vector<32x128xbf16>
    %cst_9 = arith.constant dense<0.000000e+00> : vector<20x128xf32>
    %7 = tpu.matmul %4, %6, %cst_9 {dimension_numbers = #tpu.dot_dimension_numbers<[1], [0], [0], [1], [0, 0, 1, 1], [], []>} : vector<20x32xbf16>, vector<32x128xbf16>, vector<20x128xf32> -> vector<20x128xf32>
    %8 = arith.addf %2, %7 : vector<20x128xf32>
    %c0_10 = arith.constant 0 : index
    %c1_11 = arith.constant 1 : index
    %c0_12 = arith.constant 0 : index
    %c0_13 = arith.constant 0 : index
    %9 = vector.load %arg1[%c0_10, %c1_11, %c0_12, %c0_13] : memref<1x16x30x32xbf16, #tpu.memory_space<vmem>>, vector<1x1x20x32xbf16>
    %10 = vector.shape_cast %9 : vector<1x1x20x32xbf16> to vector<20x32xbf16>
    %c1_14 = arith.constant 1 : index
    %c0_15 = arith.constant 0 : index
    %c0_16 = arith.constant 0 : index
    %11 = vector.load %arg2[%c1_14, %c0_15, %c0_16] : memref<9x32x128xbf16, #tpu.memory_space<vmem>>, vector<1x32x128xbf16>
    %12 = vector.shape_cast %11 : vector<1x32x128xbf16> to vector<32x128xbf16>
    %cst_17 = arith.constant dense<0.000000e+00> : vector<20x128xf32>
    %13 = tpu.matmul %10, %12, %cst_17 {dimension_numbers = #tpu.dot_dimension_numbers<[1], [0], [0], [1], [0, 0, 1, 1], [], []>} : vector<20x32xbf16>, vector<32x128xbf16>, vector<20x128xf32> -> vector<20x128xf32>
    %14 = arith.addf %8, %13 : vector<20x128xf32>
    %c0_18 = arith.constant 0 : index
    %c2 = arith.constant 2 : index
    %c0_19 = arith.constant 0 : index
    %c0_20 = arith.constant 0 : index
    %15 = vector.load %arg1[%c0_18, %c2, %c0_19, %c0_20] : memref<1x16x30x32xbf16, #tpu.memory_space<vmem>>, vector<1x1x20x32xbf16>
    %16 = vector.shape_cast %15 : vector<1x1x20x32xbf16> to vector<20x32xbf16>
    %c2_21 = arith.constant 2 : index
    %c0_22 = arith.constant 0 : index
    %c0_23 = arith.constant 0 : index
    %17 = vector.load %arg2[%c2_21, %c0_22, %c0_23] : memref<9x32x128xbf16, #tpu.memory_space<vmem>>, vector<1x32x128xbf16>
    %18 = vector.shape_cast %17 : vector<1x32x128xbf16> to vector<32x128xbf16>
    %cst_24 = arith.constant dense<0.000000e+00> : vector<20x128xf32>
    %19 = tpu.matmul %16, %18, %cst_24 {dimension_numbers = #tpu.dot_dimension_numbers<[1], [0], [0], [1], [0, 0, 1, 1], [], []>} : vector<20x32xbf16>, vector<32x128xbf16>, vector<20x128xf32> -> vector<20x128xf32>
    %20 = arith.addf %14, %19 : vector<20x128xf32>
    %c0_25 = arith.constant 0 : index
    %c4 = arith.constant 4 : index
    %c0_26 = arith.constant 0 : index
    %c0_27 = arith.constant 0 : index
    %21 = vector.load %arg1[%c0_25, %c4, %c0_26, %c0_27] : memref<1x16x30x32xbf16, #tpu.memory_space<vmem>>, vector<1x1x20x32xbf16>
    %22 = vector.shape_cast %21 : vector<1x1x20x32xbf16> to vector<20x32xbf16>
    %c3 = arith.constant 3 : index
    %c0_28 = arith.constant 0 : index
    %c0_29 = arith.constant 0 : index
    %23 = vector.load %arg2[%c3, %c0_28, %c0_29] : memref<9x32x128xbf16, #tpu.memory_space<vmem>>, vector<1x32x128xbf16>
    %24 = vector.shape_cast %23 : vector<1x32x128xbf16> to vector<32x128xbf16>
    %cst_30 = arith.constant dense<0.000000e+00> : vector<20x128xf32>
    %25 = tpu.matmul %22, %24, %cst_30 {dimension_numbers = #tpu.dot_dimension_numbers<[1], [0], [0], [1], [0, 0, 1, 1], [], []>} : vector<20x32xbf16>, vector<32x128xbf16>, vector<20x128xf32> -> vector<20x128xf32>
    %26 = arith.addf %20, %25 : vector<20x128xf32>
    %c0_31 = arith.constant 0 : index
    %c5 = arith.constant 5 : index
    %c0_32 = arith.constant 0 : index
    %c0_33 = arith.constant 0 : index
    %27 = vector.load %arg1[%c0_31, %c5, %c0_32, %c0_33] : memref<1x16x30x32xbf16, #tpu.memory_space<vmem>>, vector<1x1x20x32xbf16>
    %28 = vector.shape_cast %27 : vector<1x1x20x32xbf16> to vector<20x32xbf16>
    %c4_34 = arith.constant 4 : index
    %c0_35 = arith.constant 0 : index
    %c0_36 = arith.constant 0 : index
    %29 = vector.load %arg2[%c4_34, %c0_35, %c0_36] : memref<9x32x128xbf16, #tpu.memory_space<vmem>>, vector<1x32x128xbf16>
    %30 = vector.shape_cast %29 : vector<1x32x128xbf16> to vector<32x128xbf16>
    %cst_37 = arith.constant dense<0.000000e+00> : vector<20x128xf32>
    %31 = tpu.matmul %28, %30, %cst_37 {dimension_numbers = #tpu.dot_dimension_numbers<[1], [0], [0], [1], [0, 0, 1, 1], [], []>} : vector<20x32xbf16>, vector<32x128xbf16>, vector<20x128xf32> -> vector<20x128xf32>
    %32 = arith.addf %26, %31 : vector<20x128xf32>
    %c0_38 = arith.constant 0 : index
    %c6 = arith.constant 6 : index
    %c0_39 = arith.constant 0 : index
    %c0_40 = arith.constant 0 : index
    %33 = vector.load %arg1[%c0_38, %c6, %c0_39, %c0_40] : memref<1x16x30x32xbf16, #tpu.memory_space<vmem>>, vector<1x1x20x32xbf16>
    %34 = vector.shape_cast %33 : vector<1x1x20x32xbf16> to vector<20x32xbf16>
    %c5_41 = arith.constant 5 : index
    %c0_42 = arith.constant 0 : index
    %c0_43 = arith.constant 0 : index
    %35 = vector.load %arg2[%c5_41, %c0_42, %c0_43] : memref<9x32x128xbf16, #tpu.memory_space<vmem>>, vector<1x32x128xbf16>
    %36 = vector.shape_cast %35 : vector<1x32x128xbf16> to vector<32x128xbf16>
    %cst_44 = arith.constant dense<0.000000e+00> : vector<20x128xf32>
    %37 = tpu.matmul %34, %36, %cst_44 {dimension_numbers = #tpu.dot_dimension_numbers<[1], [0], [0], [1], [0, 0, 1, 1], [], []>} : vector<20x32xbf16>, vector<32x128xbf16>, vector<20x128xf32> -> vector<20x128xf32>
    %38 = arith.addf %32, %37 : vector<20x128xf32>
    %c0_45 = arith.constant 0 : index
    %c8 = arith.constant 8 : index
    %c0_46 = arith.constant 0 : index
    %c0_47 = arith.constant 0 : index
    %39 = vector.load %arg1[%c0_45, %c8, %c0_46, %c0_47] : memref<1x16x30x32xbf16, #tpu.memory_space<vmem>>, vector<1x1x20x32xbf16>
    %40 = vector.shape_cast %39 : vector<1x1x20x32xbf16> to vector<20x32xbf16>
    %c6_48 = arith.constant 6 : index
    %c0_49 = arith.constant 0 : index
    %c0_50 = arith.constant 0 : index
    %41 = vector.load %arg2[%c6_48, %c0_49, %c0_50] : memref<9x32x128xbf16, #tpu.memory_space<vmem>>, vector<1x32x128xbf16>
    %42 = vector.shape_cast %41 : vector<1x32x128xbf16> to vector<32x128xbf16>
    %cst_51 = arith.constant dense<0.000000e+00> : vector<20x128xf32>
    %43 = tpu.matmul %40, %42, %cst_51 {dimension_numbers = #tpu.dot_dimension_numbers<[1], [0], [0], [1], [0, 0, 1, 1], [], []>} : vector<20x32xbf16>, vector<32x128xbf16>, vector<20x128xf32> -> vector<20x128xf32>
    %44 = arith.addf %38, %43 : vector<20x128xf32>
    %c0_52 = arith.constant 0 : index
    %c9 = arith.constant 9 : index
    %c0_53 = arith.constant 0 : index
    %c0_54 = arith.constant 0 : index
    %45 = vector.load %arg1[%c0_52, %c9, %c0_53, %c0_54] : memref<1x16x30x32xbf16, #tpu.memory_space<vmem>>, vector<1x1x20x32xbf16>
    %46 = vector.shape_cast %45 : vector<1x1x20x32xbf16> to vector<20x32xbf16>
    %c7 = arith.constant 7 : index
    %c0_55 = arith.constant 0 : index
    %c0_56 = arith.constant 0 : index
    %47 = vector.load %arg2[%c7, %c0_55, %c0_56] : memref<9x32x128xbf16, #tpu.memory_space<vmem>>, vector<1x32x128xbf16>
    %48 = vector.shape_cast %47 : vector<1x32x128xbf16> to vector<32x128xbf16>
    %cst_57 = arith.constant dense<0.000000e+00> : vector<20x128xf32>
    %49 = tpu.matmul %46, %48, %cst_57 {dimension_numbers = #tpu.dot_dimension_numbers<[1], [0], [0], [1], [0, 0, 1, 1], [], []>} : vector<20x32xbf16>, vector<32x128xbf16>, vector<20x128xf32> -> vector<20x128xf32>
    %50 = arith.addf %44, %49 : vector<20x128xf32>
    %c0_58 = arith.constant 0 : index
    %c10 = arith.constant 10 : index
    %c0_59 = arith.constant 0 : index
    %c0_60 = arith.constant 0 : index
    %51 = vector.load %arg1[%c0_58, %c10, %c0_59, %c0_60] : memref<1x16x30x32xbf16, #tpu.memory_space<vmem>>, vector<1x1x20x32xbf16>
    %52 = vector.shape_cast %51 : vector<1x1x20x32xbf16> to vector<20x32xbf16>
    %c8_61 = arith.constant 8 : index
    %c0_62 = arith.constant 0 : index
    %c0_63 = arith.constant 0 : index
    %53 = vector.load %arg2[%c8_61, %c0_62, %c0_63] : memref<9x32x128xbf16, #tpu.memory_space<vmem>>, vector<1x32x128xbf16>
    %54 = vector.shape_cast %53 : vector<1x32x128xbf16> to vector<32x128xbf16>
    %cst_64 = arith.constant dense<0.000000e+00> : vector<20x128xf32>
    %55 = tpu.matmul %52, %54, %cst_64 {dimension_numbers = #tpu.dot_dimension_numbers<[1], [0], [0], [1], [0, 0, 1, 1], [], []>} : vector<20x32xbf16>, vector<32x128xbf16>, vector<20x128xf32> -> vector<20x128xf32>
    %56 = arith.addf %50, %55 : vector<20x128xf32>
    %57 = vector.broadcast %0 : vector<1x128xf32> to vector<20x128xf32>
    %58 = arith.mulf %56, %57 : vector<20x128xf32>
    %59 = vector.broadcast %1 : vector<1x128xf32> to vector<20x128xf32>
    %60 = arith.addf %58, %59 : vector<20x128xf32>
    %cst_65 = arith.constant 0.000000e+00 : f32
    %61 = vector.broadcast %cst_65 : f32 to vector<20x128xf32>
    %62 = arith.maximumf %60, %61 : vector<20x128xf32>
    %cst_66 = arith.constant 0.000000e+00 : f32
    %63 = vector.broadcast %cst_66 : f32 to vector<20x128xf32>
    %c0_67 = arith.constant 0 : index
    %c2_68 = arith.constant 2 : index
    %c0_69 = arith.constant 0 : index
    %c0_70 = arith.constant 0 : index
    %64 = vector.load %arg1[%c0_67, %c2_68, %c0_69, %c0_70] : memref<1x16x30x32xbf16, #tpu.memory_space<vmem>>, vector<1x1x20x32xbf16>
    %65 = vector.shape_cast %64 : vector<1x1x20x32xbf16> to vector<20x32xbf16>
    %c0_71 = arith.constant 0 : index
    %c0_72 = arith.constant 0 : index
    %c0_73 = arith.constant 0 : index
    %66 = vector.load %arg2[%c0_71, %c0_72, %c0_73] : memref<9x32x128xbf16, #tpu.memory_space<vmem>>, vector<1x32x128xbf16>
    %67 = vector.shape_cast %66 : vector<1x32x128xbf16> to vector<32x128xbf16>
    %cst_74 = arith.constant dense<0.000000e+00> : vector<20x128xf32>
    %68 = tpu.matmul %65, %67, %cst_74 {dimension_numbers = #tpu.dot_dimension_numbers<[1], [0], [0], [1], [0, 0, 1, 1], [], []>} : vector<20x32xbf16>, vector<32x128xbf16>, vector<20x128xf32> -> vector<20x128xf32>
    %69 = arith.addf %63, %68 : vector<20x128xf32>
    %c0_75 = arith.constant 0 : index
    %c3_76 = arith.constant 3 : index
    %c0_77 = arith.constant 0 : index
    %c0_78 = arith.constant 0 : index
    %70 = vector.load %arg1[%c0_75, %c3_76, %c0_77, %c0_78] : memref<1x16x30x32xbf16, #tpu.memory_space<vmem>>, vector<1x1x20x32xbf16>
    %71 = vector.shape_cast %70 : vector<1x1x20x32xbf16> to vector<20x32xbf16>
    %c1_79 = arith.constant 1 : index
    %c0_80 = arith.constant 0 : index
    %c0_81 = arith.constant 0 : index
    %72 = vector.load %arg2[%c1_79, %c0_80, %c0_81] : memref<9x32x128xbf16, #tpu.memory_space<vmem>>, vector<1x32x128xbf16>
    %73 = vector.shape_cast %72 : vector<1x32x128xbf16> to vector<32x128xbf16>
    %cst_82 = arith.constant dense<0.000000e+00> : vector<20x128xf32>
    %74 = tpu.matmul %71, %73, %cst_82 {dimension_numbers = #tpu.dot_dimension_numbers<[1], [0], [0], [1], [0, 0, 1, 1], [], []>} : vector<20x32xbf16>, vector<32x128xbf16>, vector<20x128xf32> -> vector<20x128xf32>
    %75 = arith.addf %69, %74 : vector<20x128xf32>
    %c0_83 = arith.constant 0 : index
    %c0_84 = arith.constant 0 : index
    %c1_85 = arith.constant 1 : index
    %c0_86 = arith.constant 0 : index
    %76 = vector.load %arg1[%c0_83, %c0_84, %c1_85, %c0_86] : memref<1x16x30x32xbf16, #tpu.memory_space<vmem>>, vector<1x1x20x32xbf16>
    %77 = vector.shape_cast %76 : vector<1x1x20x32xbf16> to vector<20x32xbf16>
    %c2_87 = arith.constant 2 : index
    %c0_88 = arith.constant 0 : index
    %c0_89 = arith.constant 0 : index
    %78 = vector.load %arg2[%c2_87, %c0_88, %c0_89] : memref<9x32x128xbf16, #tpu.memory_space<vmem>>, vector<1x32x128xbf16>
    %79 = vector.shape_cast %78 : vector<1x32x128xbf16> to vector<32x128xbf16>
    %cst_90 = arith.constant dense<0.000000e+00> : vector<20x128xf32>
    %80 = tpu.matmul %77, %79, %cst_90 {dimension_numbers = #tpu.dot_dimension_numbers<[1], [0], [0], [1], [0, 0, 1, 1], [], []>} : vector<20x32xbf16>, vector<32x128xbf16>, vector<20x128xf32> -> vector<20x128xf32>
    %81 = arith.addf %75, %80 : vector<20x128xf32>
    %c0_91 = arith.constant 0 : index
    %c6_92 = arith.constant 6 : index
    %c0_93 = arith.constant 0 : index
    %c0_94 = arith.constant 0 : index
    %82 = vector.load %arg1[%c0_91, %c6_92, %c0_93, %c0_94] : memref<1x16x30x32xbf16, #tpu.memory_space<vmem>>, vector<1x1x20x32xbf16>
    %83 = vector.shape_cast %82 : vector<1x1x20x32xbf16> to vector<20x32xbf16>
    %c3_95 = arith.constant 3 : index
    %c0_96 = arith.constant 0 : index
    %c0_97 = arith.constant 0 : index
    %84 = vector.load %arg2[%c3_95, %c0_96, %c0_97] : memref<9x32x128xbf16, #tpu.memory_space<vmem>>, vector<1x32x128xbf16>
    %85 = vector.shape_cast %84 : vector<1x32x128xbf16> to vector<32x128xbf16>
    %cst_98 = arith.constant dense<0.000000e+00> : vector<20x128xf32>
    %86 = tpu.matmul %83, %85, %cst_98 {dimension_numbers = #tpu.dot_dimension_numbers<[1], [0], [0], [1], [0, 0, 1, 1], [], []>} : vector<20x32xbf16>, vector<32x128xbf16>, vector<20x128xf32> -> vector<20x128xf32>
    %87 = arith.addf %81, %86 : vector<20x128xf32>
    %c0_99 = arith.constant 0 : index
    %c7_100 = arith.constant 7 : index
    %c0_101 = arith.constant 0 : index
    %c0_102 = arith.constant 0 : index
    %88 = vector.load %arg1[%c0_99, %c7_100, %c0_101, %c0_102] : memref<1x16x30x32xbf16, #tpu.memory_space<vmem>>, vector<1x1x20x32xbf16>
    %89 = vector.shape_cast %88 : vector<1x1x20x32xbf16> to vector<20x32xbf16>
    %c4_103 = arith.constant 4 : index
    %c0_104 = arith.constant 0 : index
    %c0_105 = arith.constant 0 : index
    %90 = vector.load %arg2[%c4_103, %c0_104, %c0_105] : memref<9x32x128xbf16, #tpu.memory_space<vmem>>, vector<1x32x128xbf16>
    %91 = vector.shape_cast %90 : vector<1x32x128xbf16> to vector<32x128xbf16>
    %cst_106 = arith.constant dense<0.000000e+00> : vector<20x128xf32>
    %92 = tpu.matmul %89, %91, %cst_106 {dimension_numbers = #tpu.dot_dimension_numbers<[1], [0], [0], [1], [0, 0, 1, 1], [], []>} : vector<20x32xbf16>, vector<32x128xbf16>, vector<20x128xf32> -> vector<20x128xf32>
    %93 = arith.addf %87, %92 : vector<20x128xf32>
    %c0_107 = arith.constant 0 : index
    %c4_108 = arith.constant 4 : index
    %c1_109 = arith.constant 1 : index
    %c0_110 = arith.constant 0 : index
    %94 = vector.load %arg1[%c0_107, %c4_108, %c1_109, %c0_110] : memref<1x16x30x32xbf16, #tpu.memory_space<vmem>>, vector<1x1x20x32xbf16>
    %95 = vector.shape_cast %94 : vector<1x1x20x32xbf16> to vector<20x32xbf16>
    %c5_111 = arith.constant 5 : index
    %c0_112 = arith.constant 0 : index
    %c0_113 = arith.constant 0 : index
    %96 = vector.load %arg2[%c5_111, %c0_112, %c0_113] : memref<9x32x128xbf16, #tpu.memory_space<vmem>>, vector<1x32x128xbf16>
    %97 = vector.shape_cast %96 : vector<1x32x128xbf16> to vector<32x128xbf16>
    %cst_114 = arith.constant dense<0.000000e+00> : vector<20x128xf32>
    %98 = tpu.matmul %95, %97, %cst_114 {dimension_numbers = #tpu.dot_dimension_numbers<[1], [0], [0], [1], [0, 0, 1, 1], [], []>} : vector<20x32xbf16>, vector<32x128xbf16>, vector<20x128xf32> -> vector<20x128xf32>
    %99 = arith.addf %93, %98 : vector<20x128xf32>
    %c0_115 = arith.constant 0 : index
    %c10_116 = arith.constant 10 : index
    %c0_117 = arith.constant 0 : index
    %c0_118 = arith.constant 0 : index
    %100 = vector.load %arg1[%c0_115, %c10_116, %c0_117, %c0_118] : memref<1x16x30x32xbf16, #tpu.memory_space<vmem>>, vector<1x1x20x32xbf16>
    %101 = vector.shape_cast %100 : vector<1x1x20x32xbf16> to vector<20x32xbf16>
    %c6_119 = arith.constant 6 : index
    %c0_120 = arith.constant 0 : index
    %c0_121 = arith.constant 0 : index
    %102 = vector.load %arg2[%c6_119, %c0_120, %c0_121] : memref<9x32x128xbf16, #tpu.memory_space<vmem>>, vector<1x32x128xbf16>
    %103 = vector.shape_cast %102 : vector<1x32x128xbf16> to vector<32x128xbf16>
    %cst_122 = arith.constant dense<0.000000e+00> : vector<20x128xf32>
    %104 = tpu.matmul %101, %103, %cst_122 {dimension_numbers = #tpu.dot_dimension_numbers<[1], [0], [0], [1], [0, 0, 1, 1], [], []>} : vector<20x32xbf16>, vector<32x128xbf16>, vector<20x128xf32> -> vector<20x128xf32>
    %105 = arith.addf %99, %104 : vector<20x128xf32>
    %c0_123 = arith.constant 0 : index
    %c11 = arith.constant 11 : index
    %c0_124 = arith.constant 0 : index
    %c0_125 = arith.constant 0 : index
    %106 = vector.load %arg1[%c0_123, %c11, %c0_124, %c0_125] : memref<1x16x30x32xbf16, #tpu.memory_space<vmem>>, vector<1x1x20x32xbf16>
    %107 = vector.shape_cast %106 : vector<1x1x20x32xbf16> to vector<20x32xbf16>
    %c7_126 = arith.constant 7 : index
    %c0_127 = arith.constant 0 : index
    %c0_128 = arith.constant 0 : index
    %108 = vector.load %arg2[%c7_126, %c0_127, %c0_128] : memref<9x32x128xbf16, #tpu.memory_space<vmem>>, vector<1x32x128xbf16>
    %109 = vector.shape_cast %108 : vector<1x32x128xbf16> to vector<32x128xbf16>
    %cst_129 = arith.constant dense<0.000000e+00> : vector<20x128xf32>
    %110 = tpu.matmul %107, %109, %cst_129 {dimension_numbers = #tpu.dot_dimension_numbers<[1], [0], [0], [1], [0, 0, 1, 1], [], []>} : vector<20x32xbf16>, vector<32x128xbf16>, vector<20x128xf32> -> vector<20x128xf32>
    %111 = arith.addf %105, %110 : vector<20x128xf32>
    %c0_130 = arith.constant 0 : index
    %c8_131 = arith.constant 8 : index
    %c1_132 = arith.constant 1 : index
    %c0_133 = arith.constant 0 : index
    %112 = vector.load %arg1[%c0_130, %c8_131, %c1_132, %c0_133] : memref<1x16x30x32xbf16, #tpu.memory_space<vmem>>, vector<1x1x20x32xbf16>
    %113 = vector.shape_cast %112 : vector<1x1x20x32xbf16> to vector<20x32xbf16>
    %c8_134 = arith.constant 8 : index
    %c0_135 = arith.constant 0 : index
    %c0_136 = arith.constant 0 : index
    %114 = vector.load %arg2[%c8_134, %c0_135, %c0_136] : memref<9x32x128xbf16, #tpu.memory_space<vmem>>, vector<1x32x128xbf16>
    %115 = vector.shape_cast %114 : vector<1x32x128xbf16> to vector<32x128xbf16>
    %cst_137 = arith.constant dense<0.000000e+00> : vector<20x128xf32>
    %116 = tpu.matmul %113, %115, %cst_137 {dimension_numbers = #tpu.dot_dimension_numbers<[1], [0], [0], [1], [0, 0, 1, 1], [], []>} : vector<20x32xbf16>, vector<32x128xbf16>, vector<20x128xf32> -> vector<20x128xf32>
    %117 = arith.addf %111, %116 : vector<20x128xf32>
    %118 = vector.broadcast %0 : vector<1x128xf32> to vector<20x128xf32>
    %119 = arith.mulf %117, %118 : vector<20x128xf32>
    %120 = vector.broadcast %1 : vector<1x128xf32> to vector<20x128xf32>
    %121 = arith.addf %119, %120 : vector<20x128xf32>
    %cst_138 = arith.constant 0.000000e+00 : f32
    %122 = vector.broadcast %cst_138 : f32 to vector<20x128xf32>
    %123 = arith.maximumf %121, %122 : vector<20x128xf32>
    %124 = arith.maximumf %62, %123 : vector<20x128xf32>
    %cst_139 = arith.constant 0.000000e+00 : f32
    %125 = vector.broadcast %cst_139 : f32 to vector<20x128xf32>
    %c0_140 = arith.constant 0 : index
    %c8_141 = arith.constant 8 : index
    %c0_142 = arith.constant 0 : index
    %c0_143 = arith.constant 0 : index
    %126 = vector.load %arg1[%c0_140, %c8_141, %c0_142, %c0_143] : memref<1x16x30x32xbf16, #tpu.memory_space<vmem>>, vector<1x1x20x32xbf16>
    %127 = vector.shape_cast %126 : vector<1x1x20x32xbf16> to vector<20x32xbf16>
    %c0_144 = arith.constant 0 : index
    %c0_145 = arith.constant 0 : index
    %c0_146 = arith.constant 0 : index
    %128 = vector.load %arg2[%c0_144, %c0_145, %c0_146] : memref<9x32x128xbf16, #tpu.memory_space<vmem>>, vector<1x32x128xbf16>
    %129 = vector.shape_cast %128 : vector<1x32x128xbf16> to vector<32x128xbf16>
    %cst_147 = arith.constant dense<0.000000e+00> : vector<20x128xf32>
    %130 = tpu.matmul %127, %129, %cst_147 {dimension_numbers = #tpu.dot_dimension_numbers<[1], [0], [0], [1], [0, 0, 1, 1], [], []>} : vector<20x32xbf16>, vector<32x128xbf16>, vector<20x128xf32> -> vector<20x128xf32>
    %131 = arith.addf %125, %130 : vector<20x128xf32>
    %c0_148 = arith.constant 0 : index
    %c9_149 = arith.constant 9 : index
    %c0_150 = arith.constant 0 : index
    %c0_151 = arith.constant 0 : index
    %132 = vector.load %arg1[%c0_148, %c9_149, %c0_150, %c0_151] : memref<1x16x30x32xbf16, #tpu.memory_space<vmem>>, vector<1x1x20x32xbf16>
    %133 = vector.shape_cast %132 : vector<1x1x20x32xbf16> to vector<20x32xbf16>
    %c1_152 = arith.constant 1 : index
    %c0_153 = arith.constant 0 : index
    %c0_154 = arith.constant 0 : index
    %134 = vector.load %arg2[%c1_152, %c0_153, %c0_154] : memref<9x32x128xbf16, #tpu.memory_space<vmem>>, vector<1x32x128xbf16>
    %135 = vector.shape_cast %134 : vector<1x32x128xbf16> to vector<32x128xbf16>
    %cst_155 = arith.constant dense<0.000000e+00> : vector<20x128xf32>
    %136 = tpu.matmul %133, %135, %cst_155 {dimension_numbers = #tpu.dot_dimension_numbers<[1], [0], [0], [1], [0, 0, 1, 1], [], []>} : vector<20x32xbf16>, vector<32x128xbf16>, vector<20x128xf32> -> vector<20x128xf32>
    %137 = arith.addf %131, %136 : vector<20x128xf32>
    %c0_156 = arith.constant 0 : index
    %c10_157 = arith.constant 10 : index
    %c0_158 = arith.constant 0 : index
    %c0_159 = arith.constant 0 : index
    %138 = vector.load %arg1[%c0_156, %c10_157, %c0_158, %c0_159] : memref<1x16x30x32xbf16, #tpu.memory_space<vmem>>, vector<1x1x20x32xbf16>
    %139 = vector.shape_cast %138 : vector<1x1x20x32xbf16> to vector<20x32xbf16>
    %c2_160 = arith.constant 2 : index
    %c0_161 = arith.constant 0 : index
    %c0_162 = arith.constant 0 : index
    %140 = vector.load %arg2[%c2_160, %c0_161, %c0_162] : memref<9x32x128xbf16, #tpu.memory_space<vmem>>, vector<1x32x128xbf16>
    %141 = vector.shape_cast %140 : vector<1x32x128xbf16> to vector<32x128xbf16>
    %cst_163 = arith.constant dense<0.000000e+00> : vector<20x128xf32>
    %142 = tpu.matmul %139, %141, %cst_163 {dimension_numbers = #tpu.dot_dimension_numbers<[1], [0], [0], [1], [0, 0, 1, 1], [], []>} : vector<20x32xbf16>, vector<32x128xbf16>, vector<20x128xf32> -> vector<20x128xf32>
    %143 = arith.addf %137, %142 : vector<20x128xf32>
    %c0_164 = arith.constant 0 : index
    %c12 = arith.constant 12 : index
    %c0_165 = arith.constant 0 : index
    %c0_166 = arith.constant 0 : index
    %144 = vector.load %arg1[%c0_164, %c12, %c0_165, %c0_166] : memref<1x16x30x32xbf16, #tpu.memory_space<vmem>>, vector<1x1x20x32xbf16>
    %145 = vector.shape_cast %144 : vector<1x1x20x32xbf16> to vector<20x32xbf16>
    %c3_167 = arith.constant 3 : index
    %c0_168 = arith.constant 0 : index
    %c0_169 = arith.constant 0 : index
    %146 = vector.load %arg2[%c3_167, %c0_168, %c0_169] : memref<9x32x128xbf16, #tpu.memory_space<vmem>>, vector<1x32x128xbf16>
    %147 = vector.shape_cast %146 : vector<1x32x128xbf16> to vector<32x128xbf16>
    %cst_170 = arith.constant dense<0.000000e+00> : vector<20x128xf32>
    %148 = tpu.matmul %145, %147, %cst_170 {dimension_numbers = #tpu.dot_dimension_numbers<[1], [0], [0], [1], [0, 0, 1, 1], [], []>} : vector<20x32xbf16>, vector<32x128xbf16>, vector<20x128xf32> -> vector<20x128xf32>
    %149 = arith.addf %143, %148 : vector<20x128xf32>
    %c0_171 = arith.constant 0 : index
    %c13 = arith.constant 13 : index
    %c0_172 = arith.constant 0 : index
    %c0_173 = arith.constant 0 : index
    %150 = vector.load %arg1[%c0_171, %c13, %c0_172, %c0_173] : memref<1x16x30x32xbf16, #tpu.memory_space<vmem>>, vector<1x1x20x32xbf16>
    %151 = vector.shape_cast %150 : vector<1x1x20x32xbf16> to vector<20x32xbf16>
    %c4_174 = arith.constant 4 : index
    %c0_175 = arith.constant 0 : index
    %c0_176 = arith.constant 0 : index
    %152 = vector.load %arg2[%c4_174, %c0_175, %c0_176] : memref<9x32x128xbf16, #tpu.memory_space<vmem>>, vector<1x32x128xbf16>
    %153 = vector.shape_cast %152 : vector<1x32x128xbf16> to vector<32x128xbf16>
    %cst_177 = arith.constant dense<0.000000e+00> : vector<20x128xf32>
    %154 = tpu.matmul %151, %153, %cst_177 {dimension_numbers = #tpu.dot_dimension_numbers<[1], [0], [0], [1], [0, 0, 1, 1], [], []>} : vector<20x32xbf16>, vector<32x128xbf16>, vector<20x128xf32> -> vector<20x128xf32>
    %155 = arith.addf %149, %154 : vector<20x128xf32>
    %c0_178 = arith.constant 0 : index
    %c14 = arith.constant 14 : index
    %c0_179 = arith.constant 0 : index
    %c0_180 = arith.constant 0 : index
    %156 = vector.load %arg1[%c0_178, %c14, %c0_179, %c0_180] : memref<1x16x30x32xbf16, #tpu.memory_space<vmem>>, vector<1x1x20x32xbf16>
    %157 = vector.shape_cast %156 : vector<1x1x20x32xbf16> to vector<20x32xbf16>
    %c5_181 = arith.constant 5 : index
    %c0_182 = arith.constant 0 : index
    %c0_183 = arith.constant 0 : index
    %158 = vector.load %arg2[%c5_181, %c0_182, %c0_183] : memref<9x32x128xbf16, #tpu.memory_space<vmem>>, vector<1x32x128xbf16>
    %159 = vector.shape_cast %158 : vector<1x32x128xbf16> to vector<32x128xbf16>
    %cst_184 = arith.constant dense<0.000000e+00> : vector<20x128xf32>
    %160 = tpu.matmul %157, %159, %cst_184 {dimension_numbers = #tpu.dot_dimension_numbers<[1], [0], [0], [1], [0, 0, 1, 1], [], []>} : vector<20x32xbf16>, vector<32x128xbf16>, vector<20x128xf32> -> vector<20x128xf32>
    %161 = arith.addf %155, %160 : vector<20x128xf32>
    %c0_185 = arith.constant 0 : index
    %c0_186 = arith.constant 0 : index
    %c5_187 = arith.constant 5 : index
    %c0_188 = arith.constant 0 : index
    %162 = vector.load %arg1[%c0_185, %c0_186, %c5_187, %c0_188] : memref<1x16x30x32xbf16, #tpu.memory_space<vmem>>, vector<1x1x20x32xbf16>
    %163 = vector.shape_cast %162 : vector<1x1x20x32xbf16> to vector<20x32xbf16>
    %c6_189 = arith.constant 6 : index
    %c0_190 = arith.constant 0 : index
    %c0_191 = arith.constant 0 : index
    %164 = vector.load %arg2[%c6_189, %c0_190, %c0_191] : memref<9x32x128xbf16, #tpu.memory_space<vmem>>, vector<1x32x128xbf16>
    %165 = vector.shape_cast %164 : vector<1x32x128xbf16> to vector<32x128xbf16>
    %cst_192 = arith.constant dense<0.000000e+00> : vector<20x128xf32>
    %166 = tpu.matmul %163, %165, %cst_192 {dimension_numbers = #tpu.dot_dimension_numbers<[1], [0], [0], [1], [0, 0, 1, 1], [], []>} : vector<20x32xbf16>, vector<32x128xbf16>, vector<20x128xf32> -> vector<20x128xf32>
    %167 = arith.addf %161, %166 : vector<20x128xf32>
    %c0_193 = arith.constant 0 : index
    %c1_194 = arith.constant 1 : index
    %c5_195 = arith.constant 5 : index
    %c0_196 = arith.constant 0 : index
    %168 = vector.load %arg1[%c0_193, %c1_194, %c5_195, %c0_196] : memref<1x16x30x32xbf16, #tpu.memory_space<vmem>>, vector<1x1x20x32xbf16>
    %169 = vector.shape_cast %168 : vector<1x1x20x32xbf16> to vector<20x32xbf16>
    %c7_197 = arith.constant 7 : index
    %c0_198 = arith.constant 0 : index
    %c0_199 = arith.constant 0 : index
    %170 = vector.load %arg2[%c7_197, %c0_198, %c0_199] : memref<9x32x128xbf16, #tpu.memory_space<vmem>>, vector<1x32x128xbf16>
    %171 = vector.shape_cast %170 : vector<1x32x128xbf16> to vector<32x128xbf16>
    %cst_200 = arith.constant dense<0.000000e+00> : vector<20x128xf32>
    %172 = tpu.matmul %169, %171, %cst_200 {dimension_numbers = #tpu.dot_dimension_numbers<[1], [0], [0], [1], [0, 0, 1, 1], [], []>} : vector<20x32xbf16>, vector<32x128xbf16>, vector<20x128xf32> -> vector<20x128xf32>
    %173 = arith.addf %167, %172 : vector<20x128xf32>
    %c0_201 = arith.constant 0 : index
    %c2_202 = arith.constant 2 : index
    %c5_203 = arith.constant 5 : index
    %c0_204 = arith.constant 0 : index
    %174 = vector.load %arg1[%c0_201, %c2_202, %c5_203, %c0_204] : memref<1x16x30x32xbf16, #tpu.memory_space<vmem>>, vector<1x1x20x32xbf16>
    %175 = vector.shape_cast %174 : vector<1x1x20x32xbf16> to vector<20x32xbf16>
    %c8_205 = arith.constant 8 : index
    %c0_206 = arith.constant 0 : index
    %c0_207 = arith.constant 0 : index
    %176 = vector.load %arg2[%c8_205, %c0_206, %c0_207] : memref<9x32x128xbf16, #tpu.memory_space<vmem>>, vector<1x32x128xbf16>
    %177 = vector.shape_cast %176 : vector<1x32x128xbf16> to vector<32x128xbf16>
    %cst_208 = arith.constant dense<0.000000e+00> : vector<20x128xf32>
    %178 = tpu.matmul %175, %177, %cst_208 {dimension_numbers = #tpu.dot_dimension_numbers<[1], [0], [0], [1], [0, 0, 1, 1], [], []>} : vector<20x32xbf16>, vector<32x128xbf16>, vector<20x128xf32> -> vector<20x128xf32>
    %179 = arith.addf %173, %178 : vector<20x128xf32>
    %180 = vector.broadcast %0 : vector<1x128xf32> to vector<20x128xf32>
    %181 = arith.mulf %179, %180 : vector<20x128xf32>
    %182 = vector.broadcast %1 : vector<1x128xf32> to vector<20x128xf32>
    %183 = arith.addf %181, %182 : vector<20x128xf32>
    %cst_209 = arith.constant 0.000000e+00 : f32
    %184 = vector.broadcast %cst_209 : f32 to vector<20x128xf32>
    %185 = arith.maximumf %183, %184 : vector<20x128xf32>
    %186 = arith.maximumf %124, %185 : vector<20x128xf32>
    %cst_210 = arith.constant 0.000000e+00 : f32
    %187 = vector.broadcast %cst_210 : f32 to vector<20x128xf32>
    %c0_211 = arith.constant 0 : index
    %c10_212 = arith.constant 10 : index
    %c0_213 = arith.constant 0 : index
    %c0_214 = arith.constant 0 : index
    %188 = vector.load %arg1[%c0_211, %c10_212, %c0_213, %c0_214] : memref<1x16x30x32xbf16, #tpu.memory_space<vmem>>, vector<1x1x20x32xbf16>
    %189 = vector.shape_cast %188 : vector<1x1x20x32xbf16> to vector<20x32xbf16>
    %c0_215 = arith.constant 0 : index
    %c0_216 = arith.constant 0 : index
    %c0_217 = arith.constant 0 : index
    %190 = vector.load %arg2[%c0_215, %c0_216, %c0_217] : memref<9x32x128xbf16, #tpu.memory_space<vmem>>, vector<1x32x128xbf16>
    %191 = vector.shape_cast %190 : vector<1x32x128xbf16> to vector<32x128xbf16>
    %cst_218 = arith.constant dense<0.000000e+00> : vector<20x128xf32>
    %192 = tpu.matmul %189, %191, %cst_218 {dimension_numbers = #tpu.dot_dimension_numbers<[1], [0], [0], [1], [0, 0, 1, 1], [], []>} : vector<20x32xbf16>, vector<32x128xbf16>, vector<20x128xf32> -> vector<20x128xf32>
    %193 = arith.addf %187, %192 : vector<20x128xf32>
    %c0_219 = arith.constant 0 : index
    %c11_220 = arith.constant 11 : index
    %c0_221 = arith.constant 0 : index
    %c0_222 = arith.constant 0 : index
    %194 = vector.load %arg1[%c0_219, %c11_220, %c0_221, %c0_222] : memref<1x16x30x32xbf16, #tpu.memory_space<vmem>>, vector<1x1x20x32xbf16>
    %195 = vector.shape_cast %194 : vector<1x1x20x32xbf16> to vector<20x32xbf16>
    %c1_223 = arith.constant 1 : index
    %c0_224 = arith.constant 0 : index
    %c0_225 = arith.constant 0 : index
    %196 = vector.load %arg2[%c1_223, %c0_224, %c0_225] : memref<9x32x128xbf16, #tpu.memory_space<vmem>>, vector<1x32x128xbf16>
    %197 = vector.shape_cast %196 : vector<1x32x128xbf16> to vector<32x128xbf16>
    %cst_226 = arith.constant dense<0.000000e+00> : vector<20x128xf32>
    %198 = tpu.matmul %195, %197, %cst_226 {dimension_numbers = #tpu.dot_dimension_numbers<[1], [0], [0], [1], [0, 0, 1, 1], [], []>} : vector<20x32xbf16>, vector<32x128xbf16>, vector<20x128xf32> -> vector<20x128xf32>
    %199 = arith.addf %193, %198 : vector<20x128xf32>
    %c0_227 = arith.constant 0 : index
    %c8_228 = arith.constant 8 : index
    %c1_229 = arith.constant 1 : index
    %c0_230 = arith.constant 0 : index
    %200 = vector.load %arg1[%c0_227, %c8_228, %c1_229, %c0_230] : memref<1x16x30x32xbf16, #tpu.memory_space<vmem>>, vector<1x1x20x32xbf16>
    %201 = vector.shape_cast %200 : vector<1x1x20x32xbf16> to vector<20x32xbf16>
    %c2_231 = arith.constant 2 : index
    %c0_232 = arith.constant 0 : index
    %c0_233 = arith.constant 0 : index
    %202 = vector.load %arg2[%c2_231, %c0_232, %c0_233] : memref<9x32x128xbf16, #tpu.memory_space<vmem>>, vector<1x32x128xbf16>
    %203 = vector.shape_cast %202 : vector<1x32x128xbf16> to vector<32x128xbf16>
    %cst_234 = arith.constant dense<0.000000e+00> : vector<20x128xf32>
    %204 = tpu.matmul %201, %203, %cst_234 {dimension_numbers = #tpu.dot_dimension_numbers<[1], [0], [0], [1], [0, 0, 1, 1], [], []>} : vector<20x32xbf16>, vector<32x128xbf16>, vector<20x128xf32> -> vector<20x128xf32>
    %205 = arith.addf %199, %204 : vector<20x128xf32>
    %c0_235 = arith.constant 0 : index
    %c14_236 = arith.constant 14 : index
    %c0_237 = arith.constant 0 : index
    %c0_238 = arith.constant 0 : index
    %206 = vector.load %arg1[%c0_235, %c14_236, %c0_237, %c0_238] : memref<1x16x30x32xbf16, #tpu.memory_space<vmem>>, vector<1x1x20x32xbf16>
    %207 = vector.shape_cast %206 : vector<1x1x20x32xbf16> to vector<20x32xbf16>
    %c3_239 = arith.constant 3 : index
    %c0_240 = arith.constant 0 : index
    %c0_241 = arith.constant 0 : index
    %208 = vector.load %arg2[%c3_239, %c0_240, %c0_241] : memref<9x32x128xbf16, #tpu.memory_space<vmem>>, vector<1x32x128xbf16>
    %209 = vector.shape_cast %208 : vector<1x32x128xbf16> to vector<32x128xbf16>
    %cst_242 = arith.constant dense<0.000000e+00> : vector<20x128xf32>
    %210 = tpu.matmul %207, %209, %cst_242 {dimension_numbers = #tpu.dot_dimension_numbers<[1], [0], [0], [1], [0, 0, 1, 1], [], []>} : vector<20x32xbf16>, vector<32x128xbf16>, vector<20x128xf32> -> vector<20x128xf32>
    %211 = arith.addf %205, %210 : vector<20x128xf32>
    %c0_243 = arith.constant 0 : index
    %c15 = arith.constant 15 : index
    %c0_244 = arith.constant 0 : index
    %c0_245 = arith.constant 0 : index
    %212 = vector.load %arg1[%c0_243, %c15, %c0_244, %c0_245] : memref<1x16x30x32xbf16, #tpu.memory_space<vmem>>, vector<1x1x20x32xbf16>
    %213 = vector.shape_cast %212 : vector<1x1x20x32xbf16> to vector<20x32xbf16>
    %c4_246 = arith.constant 4 : index
    %c0_247 = arith.constant 0 : index
    %c0_248 = arith.constant 0 : index
    %214 = vector.load %arg2[%c4_246, %c0_247, %c0_248] : memref<9x32x128xbf16, #tpu.memory_space<vmem>>, vector<1x32x128xbf16>
    %215 = vector.shape_cast %214 : vector<1x32x128xbf16> to vector<32x128xbf16>
    %cst_249 = arith.constant dense<0.000000e+00> : vector<20x128xf32>
    %216 = tpu.matmul %213, %215, %cst_249 {dimension_numbers = #tpu.dot_dimension_numbers<[1], [0], [0], [1], [0, 0, 1, 1], [], []>} : vector<20x32xbf16>, vector<32x128xbf16>, vector<20x128xf32> -> vector<20x128xf32>
    %217 = arith.addf %211, %216 : vector<20x128xf32>
    %c0_250 = arith.constant 0 : index
    %c12_251 = arith.constant 12 : index
    %c1_252 = arith.constant 1 : index
    %c0_253 = arith.constant 0 : index
    %218 = vector.load %arg1[%c0_250, %c12_251, %c1_252, %c0_253] : memref<1x16x30x32xbf16, #tpu.memory_space<vmem>>, vector<1x1x20x32xbf16>
    %219 = vector.shape_cast %218 : vector<1x1x20x32xbf16> to vector<20x32xbf16>
    %c5_254 = arith.constant 5 : index
    %c0_255 = arith.constant 0 : index
    %c0_256 = arith.constant 0 : index
    %220 = vector.load %arg2[%c5_254, %c0_255, %c0_256] : memref<9x32x128xbf16, #tpu.memory_space<vmem>>, vector<1x32x128xbf16>
    %221 = vector.shape_cast %220 : vector<1x32x128xbf16> to vector<32x128xbf16>
    %cst_257 = arith.constant dense<0.000000e+00> : vector<20x128xf32>
    %222 = tpu.matmul %219, %221, %cst_257 {dimension_numbers = #tpu.dot_dimension_numbers<[1], [0], [0], [1], [0, 0, 1, 1], [], []>} : vector<20x32xbf16>, vector<32x128xbf16>, vector<20x128xf32> -> vector<20x128xf32>
    %223 = arith.addf %217, %222 : vector<20x128xf32>
    %c0_258 = arith.constant 0 : index
    %c2_259 = arith.constant 2 : index
    %c5_260 = arith.constant 5 : index
    %c0_261 = arith.constant 0 : index
    %224 = vector.load %arg1[%c0_258, %c2_259, %c5_260, %c0_261] : memref<1x16x30x32xbf16, #tpu.memory_space<vmem>>, vector<1x1x20x32xbf16>
    %225 = vector.shape_cast %224 : vector<1x1x20x32xbf16> to vector<20x32xbf16>
    %c6_262 = arith.constant 6 : index
    %c0_263 = arith.constant 0 : index
    %c0_264 = arith.constant 0 : index
    %226 = vector.load %arg2[%c6_262, %c0_263, %c0_264] : memref<9x32x128xbf16, #tpu.memory_space<vmem>>, vector<1x32x128xbf16>
    %227 = vector.shape_cast %226 : vector<1x32x128xbf16> to vector<32x128xbf16>
    %cst_265 = arith.constant dense<0.000000e+00> : vector<20x128xf32>
    %228 = tpu.matmul %225, %227, %cst_265 {dimension_numbers = #tpu.dot_dimension_numbers<[1], [0], [0], [1], [0, 0, 1, 1], [], []>} : vector<20x32xbf16>, vector<32x128xbf16>, vector<20x128xf32> -> vector<20x128xf32>
    %229 = arith.addf %223, %228 : vector<20x128xf32>
    %c0_266 = arith.constant 0 : index
    %c3_267 = arith.constant 3 : index
    %c5_268 = arith.constant 5 : index
    %c0_269 = arith.constant 0 : index
    %230 = vector.load %arg1[%c0_266, %c3_267, %c5_268, %c0_269] : memref<1x16x30x32xbf16, #tpu.memory_space<vmem>>, vector<1x1x20x32xbf16>
    %231 = vector.shape_cast %230 : vector<1x1x20x32xbf16> to vector<20x32xbf16>
    %c7_270 = arith.constant 7 : index
    %c0_271 = arith.constant 0 : index
    %c0_272 = arith.constant 0 : index
    %232 = vector.load %arg2[%c7_270, %c0_271, %c0_272] : memref<9x32x128xbf16, #tpu.memory_space<vmem>>, vector<1x32x128xbf16>
    %233 = vector.shape_cast %232 : vector<1x32x128xbf16> to vector<32x128xbf16>
    %cst_273 = arith.constant dense<0.000000e+00> : vector<20x128xf32>
    %234 = tpu.matmul %231, %233, %cst_273 {dimension_numbers = #tpu.dot_dimension_numbers<[1], [0], [0], [1], [0, 0, 1, 1], [], []>} : vector<20x32xbf16>, vector<32x128xbf16>, vector<20x128xf32> -> vector<20x128xf32>
    %235 = arith.addf %229, %234 : vector<20x128xf32>
    %c0_274 = arith.constant 0 : index
    %c0_275 = arith.constant 0 : index
    %c6_276 = arith.constant 6 : index
    %c0_277 = arith.constant 0 : index
    %236 = vector.load %arg1[%c0_274, %c0_275, %c6_276, %c0_277] : memref<1x16x30x32xbf16, #tpu.memory_space<vmem>>, vector<1x1x20x32xbf16>
    %237 = vector.shape_cast %236 : vector<1x1x20x32xbf16> to vector<20x32xbf16>
    %c8_278 = arith.constant 8 : index
    %c0_279 = arith.constant 0 : index
    %c0_280 = arith.constant 0 : index
    %238 = vector.load %arg2[%c8_278, %c0_279, %c0_280] : memref<9x32x128xbf16, #tpu.memory_space<vmem>>, vector<1x32x128xbf16>
    %239 = vector.shape_cast %238 : vector<1x32x128xbf16> to vector<32x128xbf16>
    %cst_281 = arith.constant dense<0.000000e+00> : vector<20x128xf32>
    %240 = tpu.matmul %237, %239, %cst_281 {dimension_numbers = #tpu.dot_dimension_numbers<[1], [0], [0], [1], [0, 0, 1, 1], [], []>} : vector<20x32xbf16>, vector<32x128xbf16>, vector<20x128xf32> -> vector<20x128xf32>
    %241 = arith.addf %235, %240 : vector<20x128xf32>
    %242 = vector.broadcast %0 : vector<1x128xf32> to vector<20x128xf32>
    %243 = arith.mulf %241, %242 : vector<20x128xf32>
    %244 = vector.broadcast %1 : vector<1x128xf32> to vector<20x128xf32>
    %245 = arith.addf %243, %244 : vector<20x128xf32>
    %cst_282 = arith.constant 0.000000e+00 : f32
    %246 = vector.broadcast %cst_282 : f32 to vector<20x128xf32>
    %247 = arith.maximumf %245, %246 : vector<20x128xf32>
    %248 = arith.maximumf %186, %247 : vector<20x128xf32>
    %249 = arith.truncf %248 : vector<20x128xf32> to vector<20x128xbf16>
    %c0_283 = arith.constant 0 : index
    %c0_284 = arith.constant 0 : index
    %c0_285 = arith.constant 0 : index
    %250 = vector.load %arg4[%c0_283, %c0_284, %c0_285] : memref<1x20x128xbf16, #tpu.memory_space<vmem>>, vector<1x20x128xbf16>
    %251 = vector.shape_cast %250 : vector<1x20x128xbf16> to vector<20x128xbf16>
    %252 = vector.shape_cast %249 : vector<20x128xbf16> to vector<1x20x128xbf16>
    tpu.vector_store %arg4[%c0_283, %c0_284, %c0_285], %252 {strides = array<i32>} : memref<1x20x128xbf16, #tpu.memory_space<vmem>>, vector<1x20x128xbf16>,
    return
  }
  func.func @transform_0(%arg0: i32) -> (i32, i32, i32, i32) {
    %c0_i32 = arith.constant 0 : i32
    %c0_i32_0 = arith.constant 0 : i32
    %c0_i32_1 = arith.constant 0 : i32
    %c0_i32_2 = arith.constant 0 : i32
    return %arg0, %c0_i32, %c0_i32_0, %c0_i32_1 : i32, i32, i32, i32
  }
  func.func @transform_1(%arg0: i32) -> (i32, i32, i32) {
    %c0_i32 = arith.constant 0 : i32
    %c0_i32_0 = arith.constant 0 : i32
    %c0_i32_1 = arith.constant 0 : i32
    %c0_i32_2 = arith.constant 0 : i32
    return %c0_i32, %c0_i32_0, %c0_i32_1 : i32, i32, i32
  }
  func.func @transform_2(%arg0: i32) -> (i32, i32) {
    %c0_i32 = arith.constant 0 : i32
    %c0_i32_0 = arith.constant 0 : i32
    %c0_i32_1 = arith.constant 0 : i32
    return %c0_i32, %c0_i32_0 : i32, i32
  }
  func.func @transform_3(%arg0: i32) -> (i32, i32, i32) {
    %c0_i32 = arith.constant 0 : i32
    %c0_i32_0 = arith.constant 0 : i32
    %c0_i32_1 = arith.constant 0 : i32
    return %arg0, %c0_i32, %c0_i32_0 : i32, i32, i32
  }
}

module attributes {stable_mosaic.version = 11 : i64} {
  func.func @_conv_kernel(%arg0: i32, %arg1: memref<1x4x12x128xbf16, #tpu.memory_space<vmem>>, %arg2: memref<9x128x128xbf16, #tpu.memory_space<vmem>>, %arg3: memref<2x128xf32, #tpu.memory_space<vmem>>, %arg4: memref<1x6x128xbf16, #tpu.memory_space<vmem>>) attributes {dimension_semantics = [#tpu.dimension_semantics<parallel>], iteration_bounds = array<i64: 2>, scalar_prefetch = 0 : i64, scratch_operands = 0 : i64, tpu.core_type = #tpu.core_type<tc>, window_params = [{transform_indices = @transform_0, window_bounds = array<i64: 1, 4, 12, 128>}, {pipeline_mode = #tpu.pipeline_mode<synchronous>, transform_indices = @transform_1, window_bounds = array<i64: 9, 128, 128>}, {pipeline_mode = #tpu.pipeline_mode<synchronous>, transform_indices = @transform_2, window_bounds = array<i64: 2, 128>}, {transform_indices = @transform_3, window_bounds = array<i64: 1, 6, 128>}]} {
    %cst = arith.constant 0.000000e+00 : f32
    %0 = vector.broadcast %cst : f32 to vector<6x128xf32>
    %c0 = arith.constant 0 : index
    %c0_0 = arith.constant 0 : index
    %c0_1 = arith.constant 0 : index
    %c0_2 = arith.constant 0 : index
    %1 = vector.load %arg1[%c0, %c0_0, %c0_1, %c0_2] : memref<1x4x12x128xbf16, #tpu.memory_space<vmem>>, vector<1x1x6x128xbf16>
    %2 = vector.shape_cast %1 : vector<1x1x6x128xbf16> to vector<6x128xbf16>
    %c0_3 = arith.constant 0 : index
    %c0_4 = arith.constant 0 : index
    %c0_5 = arith.constant 0 : index
    %3 = vector.load %arg2[%c0_3, %c0_4, %c0_5] : memref<9x128x128xbf16, #tpu.memory_space<vmem>>, vector<1x128x128xbf16>
    %4 = vector.shape_cast %3 : vector<1x128x128xbf16> to vector<128x128xbf16>
    %cst_6 = arith.constant dense<0.000000e+00> : vector<6x128xf32>
    %5 = tpu.matmul %2, %4, %cst_6 {dimension_numbers = #tpu.dot_dimension_numbers<[1], [0], [0], [1], [0, 0, 1, 1], [], []>} : vector<6x128xbf16>, vector<128x128xbf16>, vector<6x128xf32> -> vector<6x128xf32>
    %6 = arith.addf %0, %5 : vector<6x128xf32>
    %c0_7 = arith.constant 0 : index
    %c1 = arith.constant 1 : index
    %c0_8 = arith.constant 0 : index
    %c0_9 = arith.constant 0 : index
    %7 = vector.load %arg1[%c0_7, %c1, %c0_8, %c0_9] : memref<1x4x12x128xbf16, #tpu.memory_space<vmem>>, vector<1x1x6x128xbf16>
    %8 = vector.shape_cast %7 : vector<1x1x6x128xbf16> to vector<6x128xbf16>
    %c1_10 = arith.constant 1 : index
    %c0_11 = arith.constant 0 : index
    %c0_12 = arith.constant 0 : index
    %9 = vector.load %arg2[%c1_10, %c0_11, %c0_12] : memref<9x128x128xbf16, #tpu.memory_space<vmem>>, vector<1x128x128xbf16>
    %10 = vector.shape_cast %9 : vector<1x128x128xbf16> to vector<128x128xbf16>
    %cst_13 = arith.constant dense<0.000000e+00> : vector<6x128xf32>
    %11 = tpu.matmul %8, %10, %cst_13 {dimension_numbers = #tpu.dot_dimension_numbers<[1], [0], [0], [1], [0, 0, 1, 1], [], []>} : vector<6x128xbf16>, vector<128x128xbf16>, vector<6x128xf32> -> vector<6x128xf32>
    %12 = arith.addf %6, %11 : vector<6x128xf32>
    %c0_14 = arith.constant 0 : index
    %c0_15 = arith.constant 0 : index
    %c1_16 = arith.constant 1 : index
    %c0_17 = arith.constant 0 : index
    %13 = vector.load %arg1[%c0_14, %c0_15, %c1_16, %c0_17] : memref<1x4x12x128xbf16, #tpu.memory_space<vmem>>, vector<1x1x6x128xbf16>
    %14 = vector.shape_cast %13 : vector<1x1x6x128xbf16> to vector<6x128xbf16>
    %c2 = arith.constant 2 : index
    %c0_18 = arith.constant 0 : index
    %c0_19 = arith.constant 0 : index
    %15 = vector.load %arg2[%c2, %c0_18, %c0_19] : memref<9x128x128xbf16, #tpu.memory_space<vmem>>, vector<1x128x128xbf16>
    %16 = vector.shape_cast %15 : vector<1x128x128xbf16> to vector<128x128xbf16>
    %cst_20 = arith.constant dense<0.000000e+00> : vector<6x128xf32>
    %17 = tpu.matmul %14, %16, %cst_20 {dimension_numbers = #tpu.dot_dimension_numbers<[1], [0], [0], [1], [0, 0, 1, 1], [], []>} : vector<6x128xbf16>, vector<128x128xbf16>, vector<6x128xf32> -> vector<6x128xf32>
    %18 = arith.addf %12, %17 : vector<6x128xf32>
    %c0_21 = arith.constant 0 : index
    %c2_22 = arith.constant 2 : index
    %c0_23 = arith.constant 0 : index
    %c0_24 = arith.constant 0 : index
    %19 = vector.load %arg1[%c0_21, %c2_22, %c0_23, %c0_24] : memref<1x4x12x128xbf16, #tpu.memory_space<vmem>>, vector<1x1x6x128xbf16>
    %20 = vector.shape_cast %19 : vector<1x1x6x128xbf16> to vector<6x128xbf16>
    %c3 = arith.constant 3 : index
    %c0_25 = arith.constant 0 : index
    %c0_26 = arith.constant 0 : index
    %21 = vector.load %arg2[%c3, %c0_25, %c0_26] : memref<9x128x128xbf16, #tpu.memory_space<vmem>>, vector<1x128x128xbf16>
    %22 = vector.shape_cast %21 : vector<1x128x128xbf16> to vector<128x128xbf16>
    %cst_27 = arith.constant dense<0.000000e+00> : vector<6x128xf32>
    %23 = tpu.matmul %20, %22, %cst_27 {dimension_numbers = #tpu.dot_dimension_numbers<[1], [0], [0], [1], [0, 0, 1, 1], [], []>} : vector<6x128xbf16>, vector<128x128xbf16>, vector<6x128xf32> -> vector<6x128xf32>
    %24 = arith.addf %18, %23 : vector<6x128xf32>
    %c0_28 = arith.constant 0 : index
    %c3_29 = arith.constant 3 : index
    %c0_30 = arith.constant 0 : index
    %c0_31 = arith.constant 0 : index
    %25 = vector.load %arg1[%c0_28, %c3_29, %c0_30, %c0_31] : memref<1x4x12x128xbf16, #tpu.memory_space<vmem>>, vector<1x1x6x128xbf16>
    %26 = vector.shape_cast %25 : vector<1x1x6x128xbf16> to vector<6x128xbf16>
    %c4 = arith.constant 4 : index
    %c0_32 = arith.constant 0 : index
    %c0_33 = arith.constant 0 : index
    %27 = vector.load %arg2[%c4, %c0_32, %c0_33] : memref<9x128x128xbf16, #tpu.memory_space<vmem>>, vector<1x128x128xbf16>
    %28 = vector.shape_cast %27 : vector<1x128x128xbf16> to vector<128x128xbf16>
    %cst_34 = arith.constant dense<0.000000e+00> : vector<6x128xf32>
    %29 = tpu.matmul %26, %28, %cst_34 {dimension_numbers = #tpu.dot_dimension_numbers<[1], [0], [0], [1], [0, 0, 1, 1], [], []>} : vector<6x128xbf16>, vector<128x128xbf16>, vector<6x128xf32> -> vector<6x128xf32>
    %30 = arith.addf %24, %29 : vector<6x128xf32>
    %c0_35 = arith.constant 0 : index
    %c2_36 = arith.constant 2 : index
    %c1_37 = arith.constant 1 : index
    %c0_38 = arith.constant 0 : index
    %31 = vector.load %arg1[%c0_35, %c2_36, %c1_37, %c0_38] : memref<1x4x12x128xbf16, #tpu.memory_space<vmem>>, vector<1x1x6x128xbf16>
    %32 = vector.shape_cast %31 : vector<1x1x6x128xbf16> to vector<6x128xbf16>
    %c5 = arith.constant 5 : index
    %c0_39 = arith.constant 0 : index
    %c0_40 = arith.constant 0 : index
    %33 = vector.load %arg2[%c5, %c0_39, %c0_40] : memref<9x128x128xbf16, #tpu.memory_space<vmem>>, vector<1x128x128xbf16>
    %34 = vector.shape_cast %33 : vector<1x128x128xbf16> to vector<128x128xbf16>
    %cst_41 = arith.constant dense<0.000000e+00> : vector<6x128xf32>
    %35 = tpu.matmul %32, %34, %cst_41 {dimension_numbers = #tpu.dot_dimension_numbers<[1], [0], [0], [1], [0, 0, 1, 1], [], []>} : vector<6x128xbf16>, vector<128x128xbf16>, vector<6x128xf32> -> vector<6x128xf32>
    %36 = arith.addf %30, %35 : vector<6x128xf32>
    %c0_42 = arith.constant 0 : index
    %c0_43 = arith.constant 0 : index
    %c3_44 = arith.constant 3 : index
    %c0_45 = arith.constant 0 : index
    %37 = vector.load %arg1[%c0_42, %c0_43, %c3_44, %c0_45] : memref<1x4x12x128xbf16, #tpu.memory_space<vmem>>, vector<1x1x6x128xbf16>
    %38 = vector.shape_cast %37 : vector<1x1x6x128xbf16> to vector<6x128xbf16>
    %c6 = arith.constant 6 : index
    %c0_46 = arith.constant 0 : index
    %c0_47 = arith.constant 0 : index
    %39 = vector.load %arg2[%c6, %c0_46, %c0_47] : memref<9x128x128xbf16, #tpu.memory_space<vmem>>, vector<1x128x128xbf16>
    %40 = vector.shape_cast %39 : vector<1x128x128xbf16> to vector<128x128xbf16>
    %cst_48 = arith.constant dense<0.000000e+00> : vector<6x128xf32>
    %41 = tpu.matmul %38, %40, %cst_48 {dimension_numbers = #tpu.dot_dimension_numbers<[1], [0], [0], [1], [0, 0, 1, 1], [], []>} : vector<6x128xbf16>, vector<128x128xbf16>, vector<6x128xf32> -> vector<6x128xf32>
    %42 = arith.addf %36, %41 : vector<6x128xf32>
    %c0_49 = arith.constant 0 : index
    %c1_50 = arith.constant 1 : index
    %c3_51 = arith.constant 3 : index
    %c0_52 = arith.constant 0 : index
    %43 = vector.load %arg1[%c0_49, %c1_50, %c3_51, %c0_52] : memref<1x4x12x128xbf16, #tpu.memory_space<vmem>>, vector<1x1x6x128xbf16>
    %44 = vector.shape_cast %43 : vector<1x1x6x128xbf16> to vector<6x128xbf16>
    %c7 = arith.constant 7 : index
    %c0_53 = arith.constant 0 : index
    %c0_54 = arith.constant 0 : index
    %45 = vector.load %arg2[%c7, %c0_53, %c0_54] : memref<9x128x128xbf16, #tpu.memory_space<vmem>>, vector<1x128x128xbf16>
    %46 = vector.shape_cast %45 : vector<1x128x128xbf16> to vector<128x128xbf16>
    %cst_55 = arith.constant dense<0.000000e+00> : vector<6x128xf32>
    %47 = tpu.matmul %44, %46, %cst_55 {dimension_numbers = #tpu.dot_dimension_numbers<[1], [0], [0], [1], [0, 0, 1, 1], [], []>} : vector<6x128xbf16>, vector<128x128xbf16>, vector<6x128xf32> -> vector<6x128xf32>
    %48 = arith.addf %42, %47 : vector<6x128xf32>
    %c0_56 = arith.constant 0 : index
    %c0_57 = arith.constant 0 : index
    %c4_58 = arith.constant 4 : index
    %c0_59 = arith.constant 0 : index
    %49 = vector.load %arg1[%c0_56, %c0_57, %c4_58, %c0_59] : memref<1x4x12x128xbf16, #tpu.memory_space<vmem>>, vector<1x1x6x128xbf16>
    %50 = vector.shape_cast %49 : vector<1x1x6x128xbf16> to vector<6x128xbf16>
    %c8 = arith.constant 8 : index
    %c0_60 = arith.constant 0 : index
    %c0_61 = arith.constant 0 : index
    %51 = vector.load %arg2[%c8, %c0_60, %c0_61] : memref<9x128x128xbf16, #tpu.memory_space<vmem>>, vector<1x128x128xbf16>
    %52 = vector.shape_cast %51 : vector<1x128x128xbf16> to vector<128x128xbf16>
    %cst_62 = arith.constant dense<0.000000e+00> : vector<6x128xf32>
    %53 = tpu.matmul %50, %52, %cst_62 {dimension_numbers = #tpu.dot_dimension_numbers<[1], [0], [0], [1], [0, 0, 1, 1], [], []>} : vector<6x128xbf16>, vector<128x128xbf16>, vector<6x128xf32> -> vector<6x128xf32>
    %54 = arith.addf %48, %53 : vector<6x128xf32>
    %c0_63 = arith.constant 0 : index
    %c0_64 = arith.constant 0 : index
    %55 = vector.load %arg3[%c0_63, %c0_64] : memref<2x128xf32, #tpu.memory_space<vmem>>, vector<1x128xf32>
    %56 = vector.broadcast %55 : vector<1x128xf32> to vector<6x128xf32>
    %57 = arith.mulf %54, %56 : vector<6x128xf32>
    %c1_65 = arith.constant 1 : index
    %c0_66 = arith.constant 0 : index
    %58 = vector.load %arg3[%c1_65, %c0_66] : memref<2x128xf32, #tpu.memory_space<vmem>>, vector<1x128xf32>
    %59 = vector.broadcast %58 : vector<1x128xf32> to vector<6x128xf32>
    %60 = arith.addf %57, %59 : vector<6x128xf32>
    %cst_67 = arith.constant 0.000000e+00 : f32
    %61 = vector.broadcast %cst_67 : f32 to vector<6x128xf32>
    %62 = arith.maximumf %60, %61 : vector<6x128xf32>
    %63 = arith.truncf %62 : vector<6x128xf32> to vector<6x128xbf16>
    %c0_68 = arith.constant 0 : index
    %c0_69 = arith.constant 0 : index
    %c0_70 = arith.constant 0 : index
    %64 = vector.load %arg4[%c0_68, %c0_69, %c0_70] : memref<1x6x128xbf16, #tpu.memory_space<vmem>>, vector<1x6x128xbf16>
    %65 = vector.shape_cast %64 : vector<1x6x128xbf16> to vector<6x128xbf16>
    %66 = vector.shape_cast %63 : vector<6x128xbf16> to vector<1x6x128xbf16>
    tpu.vector_store %arg4[%c0_68, %c0_69, %c0_70], %66 {strides = array<i32>} : memref<1x6x128xbf16, #tpu.memory_space<vmem>>, vector<1x6x128xbf16>,
    return
  }
  func.func @transform_0(%arg0: i32) -> (i32, i32, i32, i32) {
    %c0_i32 = arith.constant 0 : i32
    %c0_i32_0 = arith.constant 0 : i32
    %c0_i32_1 = arith.constant 0 : i32
    %c0_i32_2 = arith.constant 0 : i32
    return %arg0, %c0_i32, %c0_i32_0, %c0_i32_1 : i32, i32, i32, i32
  }
  func.func @transform_1(%arg0: i32) -> (i32, i32, i32) {
    %c0_i32 = arith.constant 0 : i32
    %c0_i32_0 = arith.constant 0 : i32
    %c0_i32_1 = arith.constant 0 : i32
    %c0_i32_2 = arith.constant 0 : i32
    return %c0_i32, %c0_i32_0, %c0_i32_1 : i32, i32, i32
  }
  func.func @transform_2(%arg0: i32) -> (i32, i32) {
    %c0_i32 = arith.constant 0 : i32
    %c0_i32_0 = arith.constant 0 : i32
    %c0_i32_1 = arith.constant 0 : i32
    return %c0_i32, %c0_i32_0 : i32, i32
  }
  func.func @transform_3(%arg0: i32) -> (i32, i32, i32) {
    %c0_i32 = arith.constant 0 : i32
    %c0_i32_0 = arith.constant 0 : i32
    %c0_i32_1 = arith.constant 0 : i32
    return %arg0, %c0_i32, %c0_i32_0 : i32, i32, i32
  }
}

</mosaic_0001>

<bundles_post_ra>
// kernel: protonet_forward.3
= control target key start
LH: loop header
LB: loop body
LE: loop exit
PB: predicated region body
PF: predicated region fallthrough
CT: control target
= control target key end

     0   :  { %s1889_s12 = smov 0   ;;  %s2248_s0 = inlined_call_operand.vmem [shape: bf16[2,4,12,128], index: 0, kind: input, shape index: {}]   ;;  %s2249_s1 = inlined_call_operand.vmem [shape: bf16[9,128,128], index: 1, kind: input, shape index: {}]   ;;  %s2250_s2 = inlined_call_operand.vmem [shape: f32[2,128], index: 2, kind: input, shape index: {}]   ;;  %s2251_s3 = inlined_call_operand.vmem [shape: bf16[2,6,128], index: 3, kind: output, shape index: {}]  }
   0x1 LB: > { %s1258_s13 = sadd.s32 4294967295, %s1865_s12   ;;  %p1262_p0 = scmp.ge.s32.totalorder %s1865_s12, 1  ;;  %s1865_s12 = sphi %s1889_s12, %s13_s12  }
   0x2   : > { %p137_p1 = scmp.lt.s32.totalorder %s1865_s12, 3 }
   0x4   : > { %p138_p2 = pnand %p1262_p0, %p137_p1 }
   0x5   : > { %v1782_v0 = vld [vmem:[%s2249_s1 + $0x40] sm:$0xff] (!%p138_p2)   ;;  %v1867_v1 = vmov (!%p138_p2), 0.0   ;;  %v1784_v3 = vld [vmem:[%s2249_s1 + $0x48] sm:$0xff] (!%p138_p2)   ;;  %vm1868_vm0 = vmmov (!%p138_p2), 0   ;;  %v1786_v5 = vld [vmem:[%s2249_s1 + $0x50] sm:$0xff] (!%p138_p2)   ;;  %p160_p3 = scmp.lt.s32.totalorder (!%p138_p2), %s1258_s13, 1 }
   0x6   : > { %141 = sbr.rel (%p138_p2) target bundleno = 390 (0x186), region = 32  ;;  %1563 = vmatprep.subr.bf16.mxu1 (!%p138_p2), %v1867_v1  ;;  %1643 = vmatprep.subr.bf16.mxu0 (!%p138_p2), %v1867_v1  ;;  %v1783_v2 = vld [vmem:[%s2249_s1 + $0x100] sm:$0xff] (!%p138_p2)   ;;  %v1785_v4 = vld [vmem:[%s2249_s1 + $0x108] sm:$0xff] (!%p138_p2)   ;;  %v1787_v6 = vld [vmem:[%s2249_s1 + $0x110] sm:$0xff] (!%p138_p2)  }
   0x7   : > { %1564 = vmatpush3.bf16.msra.mxu1 (!%p138_p2), %v1782_v0  ;;  %1579 = vmatprep.mubr.msk.bf16.mxu1 (!%p138_p2), %vm1868_vm0, %v1867_v1  ;;  %v1788_v7 = vld [vmem:[%s2249_s1 + $0x58] sm:$0xff] (!%p138_p2)   ;;  %v1790_v9 = vld [vmem:[%s2249_s1 + $0x60] sm:$0xff] (!%p138_p2)   ;;  %v1792_v11 = vld [vmem:[%s2249_s1 + $0x68] sm:$0xff] (!%p138_p2)  }
   0x8   : > { %1644 = vmatpush3.bf16.msra.mxu0 (!%p138_p2), %v1783_v2  ;;  %1565 = vmatprep.subr.bf16.mxu1 (!%p138_p2), %v1867_v1  ;;  %v1789_v8 = vld [vmem:[%s2249_s1 + $0x118] sm:$0xff] (!%p138_p2)   ;;  %v1791_v10 = vld [vmem:[%s2249_s1 + $0x120] sm:$0xff] (!%p138_p2)   ;;  %v1793_v12 = vld [vmem:[%s2249_s1 + $0x128] sm:$0xff] (!%p138_p2)  }
   0x9   : > { %1645 = vmatprep.subr.bf16.mxu0 (!%p138_p2), %v1867_v1  ;;  %1659 = vmatprep.mubr.msk.bf16.mxu0 (!%p138_p2), %vm1868_vm0, %v1867_v1  ;;  %v1794_v13 = vld [vmem:[%s2249_s1 + $0x70] sm:$0xff] (!%p138_p2)   ;;  %v1796_v15 = vld [vmem:[%s2249_s1 + $0x78] sm:$0xff] (!%p138_p2)   ;;  %v1798_v18 = vld [vmem:[%s2249_s1] sm:$0xff] (!%p138_p2)  }
   0xa   : > { %v1795_v14 = vld [vmem:[%s2249_s1 + $0x130] sm:$0xff] (!%p138_p2)   ;;  %v1797_v16 = vld [vmem:[%s2249_s1 + $0x138] sm:$0xff] (!%p138_p2)   ;;  %v1799_v20 = vld [vmem:[%s2249_s1 + $0x140] sm:$0xff] (!%p138_p2)  }
   0xb   : > { %1566 = vmatpush3.bf16.msra.mxu1 (!%p138_p2), %v1784_v3  ;;  %v1800_v21 = vld [vmem:[%s2249_s1 + $0x8] sm:$0xff] (!%p138_p2)   ;;  %v1802_v23 = vld [vmem:[%s2249_s1 + $0x10] sm:$0xff] (!%p138_p2)   ;;  %v1804_v25 = vld [vmem:[%s2249_s1 + $0x18] sm:$0xff] (!%p138_p2)  }
   0xc   : > { %1646 = vmatpush3.bf16.msra.mxu0 (!%p138_p2), %v1785_v4  ;;  %1567 = vmatprep.subr.bf16.mxu1 (!%p138_p2), %v1867_v1  ;;  %v1801_v22 = vld [vmem:[%s2249_s1 + $0x148] sm:$0xff] (!%p138_p2)   ;;  %v1803_v24 = vld [vmem:[%s2249_s1 + $0x150] sm:$0xff] (!%p138_p2)   ;;  %v1805_v26 = vld [vmem:[%s2249_s1 + $0x158] sm:$0xff] (!%p138_p2)  }
   0xd   : > { %1647 = vmatprep.subr.bf16.mxu0 %v1867_v1  ;;  %s2253_s13 = smov (!%p160_p3, %s1258_s13), 1  ;;  %v1806_v27 = vld [vmem:[%s2249_s1 + $0x20] sm:$0xff]   ;;  %v1808_v29 = vld [vmem:[%s2249_s1 + $0x28] sm:$0xff]   ;;  %v1810_v32 = vld [vmem:[%s2249_s1 + $0x30] sm:$0xff]  }
   0xe   : > { %s1481_s15 = sshll.u32 %s2253_s13, 5  ;;  %v1807_v28 = vld [vmem:[%s2249_s1 + $0x160] sm:$0xff]   ;;  %v1809_v31 = vld [vmem:[%s2249_s1 + $0x168] sm:$0xff]   ;;  %v1811_v34 = vld [vmem:[%s2249_s1 + $0x170] sm:$0xff]   ;;  %s1265_s19 = sshll.u32 %s2253_s13, 2 }
   0xf   : > { %1568 = vmatpush3.bf16.msra.mxu1 %v1786_v5  ;;  %s1967_s20 = scalar_lea.vmem %s2248_s0, %s1481_s15  ;;  %v1812_v35 = vld [vmem:[%s2249_s1 + $0x38] sm:$0xff]   ;;  %v1814_v40 = vld [vmem:[%s2249_s1 + $0x80] sm:$0xff]   ;;  %v1817_v43 = vld [vmem:[%s2249_s1 + $0x88] sm:$0xff]   ;;  %s168_s23 = scalar_lea.vmem %s2251_s3, %s1265_s19 }
  0x10   : > { %1648 = vmatpush3.bf16.msra.mxu0 %v1787_v6  ;;  %1569 = vmatprep.subr.bf16.mxu1 %v1867_v1  ;;  %v1266_v17 = vld [vmem:[%s1967_s20 + $0x8] sm:$0x7]  ;;  %v1349_v19 = vld [vmem:[%s1967_s20 + $0x18] sm:$0x7]  ;;  %v1815_v30 = vld [vmem:[%s1967_s20 + $0x10] ss:$0 sps:$4 sm:$0xff]  }
  0x11   : > { %1649 = vmatprep.subr.bf16.mxu0 %v1867_v1  ;;  %v740_v33 = vshll.u32 %v1815_v30, 16  ;;  %v738_v36 = vshrl.u32 %v1815_v30, 16  ;;  %v1813_v38 = vld [vmem:[%s2249_s1 + $0x178] sm:$0xff]   ;;  %v170_v39 = vld [vmem:[%s1967_s20] sm:$0x7]  ;;  %v1818_v44 = vld [vmem:[%s2249_s1 + $0x188] sm:$0xff]  }
  0x12   : > { %v1816_v42 = vld [vmem:[%s2249_s1 + $0x180] sm:$0xff]   ;;  %v1819_v45 = vld [vmem:[%s2249_s1 + $0x90] sm:$0xff]   ;;  %v1821_v47 = vld [vmem:[%s2249_s1 + $0x98] sm:$0xff]  }
  0x13   : > { %1570 = vmatpush3.bf16.msra.mxu1 %v1788_v7  ;;  %v742_v37 = vrot.slane %v740_v33, 1  ;;  %v1820_v46 = vld [vmem:[%s2249_s1 + $0x190] sm:$0xff]   ;;  %v1822_v48 = vld [vmem:[%s2249_s1 + $0x198] sm:$0xff]   ;;  %v2086_v49 = vld [vmem:[%s1967_s20 + $0x4] sm:$0x1] }
  0x14   : > { %1650 = vmatpush3.bf16.msra.mxu0 %v1789_v8  ;;  %1571 = vmatprep.subr.bf16.mxu1 %v1867_v1  ;;  %v2089_v50 = vld [vmem:[%s1967_s20] sm:$0xc]  ;;  %v1831_v55 = vld [vmem:[%s1967_s20] ss:$0 sps:$4 sm:$0xff]   ;;  %v1825_v56 = vld [vmem:[%s2249_s1 + $0xa8] sm:$0xff]  }
  0x15   : > { %1651 = vmatprep.subr.bf16.mxu0 %v1867_v1  ;;  %v743_v41 = vor.u32 %v742_v37, %v738_v36  ;;  %v1823_v51 = vld [vmem:[%s2249_s1 + $0xa0] sm:$0xff]   ;;  %v1468_v52 = vcombine.low %v2089_v50, %v2086_v49  ;;  %v1826_v58 = vld [vmem:[%s2249_s1 + $0x1a8] sm:$0xff]   ;;  %v406_v59 = vshll.u32 %v1831_v55, 16  ;;  %v1827_v60 = vld [vmem:[%s2249_s1 + $0xb0] sm:$0xff]   ;;  %v404_v0 = vshrl.u32 %v1831_v55, 16 }
  0x16   : > { %v1824_v53 = vld [vmem:[%s2249_s1 + $0x1a0] sm:$0xff]   ;;  %v1828_v63 = vld [vmem:[%s2249_s1 + $0x1b0] sm:$0xff]   ;;  %v1829_v3 = vld [vmem:[%s2249_s1 + $0xb8] sm:$0xff]  }
  0x17   : > { %1572 = vmatpush3.bf16.msra.mxu1 %v1790_v9  ;;  %v834_v54 = vld [vmem:[%s1967_s20] sm:$0xe]  ;;  %v408_v2 = vrot.slane %v406_v59, 1  ;;  %v1830_v6 = vld [vmem:[%s2249_s1 + $0x1b8] sm:$0xff]   ;;  %v1324_v30 = vld [vmem:[%s1967_s20 + $0x10] sm:$0x7] }
  0x18   : > { %1652 = vmatpush3.bf16.msra.mxu0 %v1791_v10  ;;  %1573 = vmatprep.subr.bf16.mxu1 %v1867_v1  ;;  %v1416_v57 = vcombine.low %v834_v54, %v2086_v49  ;;  %v1832_v8 = vld [vmem:[%s2249_s1 + $0xc0] sm:$0xff]   ;;  %v1851_v33 = vld [vmem:[%s2249_s1 + $0x208] sm:$0xff]  }
  0x19   : > { %1653 = vmatprep.subr.bf16.mxu0 %v1867_v1  ;;  %v409_v7 = vor.u32 %v408_v2, %v404_v0  ;;  %v1834_v10 = vld [vmem:[%s2249_s1 + $0x1c0] sm:$0xff]   ;;  %v1855_v37 = vld [vmem:[%s2249_s1 + $0x228] sm:$0xff]  }
  0x1a   : > { %v859_v61 = vshrl.u32 %v1416_v57, 16  ;;  %v862_v62 = vshll.u32 %v1416_v57, 16  ;;  %v1854_v36 = vld [vmem:[%s2249_s1 + $0x220] sm:$0xff]  }
  0x1b   : > { %1574 = vmatpush3.bf16.msra.mxu1 %v1792_v11  ;;  %v1835_v11 = vld [vmem:[%s2249_s1 + $0xc8] sm:$0xff]  }
  0x1c   : > { %1654 = vmatpush3.bf16.msra.mxu0 %v1793_v12  ;;  %1575 = vmatprep.subr.bf16.mxu1 %v1867_v1  ;;  %v861_v4 = vrot.slane %v859_v61, 1  ;;  %v864_v5 = vrot.slane %v862_v62, 2  ;;  %v1836_v12 = vld [vmem:[%s2249_s1 + $0x1c8] sm:$0xff]  }
  0x1d   : > { %1655 = vmatprep.subr.bf16.mxu0 %v1867_v1 }
  0x1e   : > { %v865_v9 = vor.u32 %v864_v5, %v861_v4 }
  0x1f   : > { %1576 = vmatpush3.bf16.msra.mxu1 %v1794_v13  ;;  %v1837_v13 = vld [vmem:[%s2249_s1 + $0xd0] sm:$0xff]  }
  0x20   : > { %1656 = vmatpush3.bf16.msra.mxu0 %v1795_v14  ;;  %1577 = vmatprep.subr.bf16.mxu1 %v1867_v1  ;;  %v1838_v14 = vld [vmem:[%s2249_s1 + $0x1d0] sm:$0xff]  }
  0x21   : > { %1657 = vmatprep.subr.bf16.mxu0 %v1867_v1 }
  0x23   : > { %1578 = vmatpush3.bf16.msra.mxu1 %v1796_v15  ;;  %v1839_v15 = vld [vmem:[%s2249_s1 + $0xd8] sm:$0xff]  }
  0x24   : > { %1658 = vmatpush3.bf16.msra.mxu0 %v1797_v16  ;;  %1583 = vmatprep.subr.bf16.mxu1 %v1867_v1  ;;  %v1840_v16 = vld [vmem:[%s2249_s1 + $0x1d8] sm:$0xff]  }
  0x25   : > { %1663 = vmatprep.subr.bf16.mxu0 %v1867_v1 }
  0x26   : > { %1580 = vmatmul.mubr.bf16.vlgmr.msra.gmra.mrb[0].mxu1 %v1266_v17  ;;  %v1841_v17 = vld [vmem:[%s2249_s1 + $0xe0] sm:$0xff]  }
  0x27   : > { %1584 = vmatpush3.bf16.msra.mxu1 %v1798_v18  ;;  %1660 = vmatmul.mubr.bf16.vlgmr.msra.gmra.mrb[0].mxu0 %v1349_v19  ;;  %v1842_v18 = vld [vmem:[%s2249_s1 + $0x1e0] sm:$0xff]   ;;  %v1843_v19 = vld [vmem:[%s2249_s1 + $0xe8] sm:$0xff]  }
  0x28   : > { %1664 = vmatpush3.bf16.msra.mxu0 %v1799_v20  ;;  %1585 = vmatprep.subr.bf16.mxu1 %v1867_v1  ;;  %v1849_v20 = vld [vmem:[%s1967_s20 + $0x8] sm:$0x1e]  }
  0x29   : > { %1665 = vmatprep.subr.bf16.mxu0 %v1867_v1  ;;  %1599 = vmatprep.mubr.msk.bf16.mxu1 %vm1868_vm0, %v1867_v1 }
  0x2a   : > { %1679 = vmatprep.mubr.msk.bf16.mxu0 %vm1868_vm0, %v1867_v1 }
  0x2b   : > { %1586 = vmatpush3.bf16.msra.mxu1 %v1800_v21  ;;  %v1844_v21 = vld [vmem:[%s2249_s1 + $0x1e8] sm:$0xff]  }
  0x2c   : > { %1666 = vmatpush3.bf16.msra.mxu0 %v1801_v22  ;;  %1587 = vmatprep.subr.bf16.mxu1 %v1867_v1  ;;  %v1845_v22 = vld [vmem:[%s2249_s1 + $0xf0] sm:$0xff]  }
  0x2d   : > { %1667 = vmatprep.subr.bf16.mxu0 %v1867_v1 }
  0x2f   : > { %1588 = vmatpush3.bf16.msra.mxu1 %v1802_v23  ;;  %v981_v23 = vshrl.u32 %v1849_v20, 16 }
  0x30   : > { %1668 = vmatpush3.bf16.msra.mxu0 %v1803_v24  ;;  %1589 = vmatprep.subr.bf16.mxu1 %v1867_v1  ;;  %v984_v24 = vshll.u32 %v1849_v20, 16 }
  0x31   : > { %1669 = vmatprep.subr.bf16.mxu0 %v1867_v1 }
  0x33   : > { %1590 = vmatpush3.bf16.msra.mxu1 %v1804_v25  ;;  %v1846_v25 = vld [vmem:[%s2249_s1 + $0x1f0] sm:$0xff]  }
  0x34   : > { %1670 = vmatpush3.bf16.msra.mxu0 %v1805_v26  ;;  %1591 = vmatprep.subr.bf16.mxu1 %v1867_v1  ;;  %v1847_v26 = vld [vmem:[%s2249_s1 + $0xf8] sm:$0xff]  }
  0x35   : > { %1671 = vmatprep.subr.bf16.mxu0 %v1867_v1 }
  0x37   : > { %1592 = vmatpush3.bf16.msra.mxu1 %v1806_v27  ;;  %v983_v27 = vrot.slane %v981_v23, 1 }
  0x38   : > { %1672 = vmatpush3.bf16.msra.mxu0 %v1807_v28  ;;  %1593 = vmatprep.subr.bf16.mxu1 %v1867_v1  ;;  %v986_v28 = vrot.slane %v984_v24, 2 }
  0x39   : > { %1673 = vmatprep.subr.bf16.mxu0 %v1867_v1 }
  0x3b   : > { %1594 = vmatpush3.bf16.msra.mxu1 %v1808_v29  ;;  %v1848_v29 = vld [vmem:[%s2249_s1 + $0x1f8] sm:$0xff]  }
  0x3c   : > { %1674 = vmatpush3.bf16.msra.mxu0 %v1809_v31  ;;  %1595 = vmatprep.subr.bf16.mxu1 %v1867_v1  ;;  %v987_v31 = vor.u32 %v986_v28, %v983_v27 }
  0x3d   : > { %1675 = vmatprep.subr.bf16.mxu0 %v1867_v1 }
  0x3f   : > { %1596 = vmatpush3.bf16.msra.mxu1 %v1810_v32  ;;  %v1850_v32 = vld [vmem:[%s2249_s1 + $0x200] sm:$0xff]  }
  0x40   : > { %1676 = vmatpush3.bf16.msra.mxu0 %v1811_v34  ;;  %1597 = vmatprep.subr.bf16.mxu1 %v1867_v1  ;;  %v1852_v34 = vld [vmem:[%s2249_s1 + $0x210] sm:$0xff]  }
  0x41   : > { %1677 = vmatprep.subr.bf16.mxu0 %v1867_v1 }
  0x43   : > { %1598 = vmatpush3.bf16.msra.mxu1 %v1812_v35  ;;  %v1853_v35 = vld [vmem:[%s2249_s1 + $0x218] sm:$0xff]  }
  0x44   : > { %1678 = vmatpush3.bf16.msra.mxu0 %v1813_v38  ;;  %1603 = vmatprep.subr.bf16.mxu1 %v1867_v1  ;;  %v1856_v38 = vld [vmem:[%s2249_s1 + $0x230] sm:$0xff]  }
  0x45   : > { %1683 = vmatprep.subr.bf16.mxu0 %v1867_v1 }
  0x46   : > { %1600 = vmatmul.mubr.bf16.vlgmr.msra.gmra.mrb[0].mxu1 %v170_v39  ;;  %v1857_v39 = vld [vmem:[%s2249_s1 + $0x238] sm:$0xff]  }
  0x47   : > { %1604 = vmatpush3.bf16.msra.mxu1 %v1814_v40  ;;  %1680 = vmatmul.mubr.bf16.vlgmr.msra.gmra.mrb[0].mxu0 %v743_v41  ;;  %v1099_v40 = vrot.slane %v1468_v52, 2 }
  0x48   : > { %1684 = vmatpush3.bf16.msra.mxu0 %v1816_v42  ;;  %1605 = vmatprep.subr.bf16.mxu1 %v1867_v1 }
  0x49   : > { %1685 = vmatprep.subr.bf16.mxu0 %v1867_v1  ;;  %1619 = vmatprep.mubr.msk.bf16.mxu1 %vm1868_vm0, %v1867_v1 }
  0x4a   : > { %1699 = vmatprep.mubr.msk.bf16.mxu0 %vm1868_vm0, %v1867_v1 }
  0x4b   : > { %1606 = vmatpush3.bf16.msra.mxu1 %v1817_v43 }
  0x4c   : > { %1686 = vmatpush3.bf16.msra.mxu0 %v1818_v44  ;;  %1607 = vmatprep.subr.bf16.mxu1 %v1867_v1 }
  0x4d   : > { %1687 = vmatprep.subr.bf16.mxu0 %v1867_v1 }
  0x4f   : > { %1608 = vmatpush3.bf16.msra.mxu1 %v1819_v45 }
  0x50   : > { %1688 = vmatpush3.bf16.msra.mxu0 %v1820_v46  ;;  %1609 = vmatprep.subr.bf16.mxu1 %v1867_v1  ;;  %v1477_v46 = vld [vmem:[%s2250_s2] ss:$0 sm:$0xff] }
  0x51   : > { %1689 = vmatprep.subr.bf16.mxu0 %v1867_v1 }
  0x53   : > { %1610 = vmatpush3.bf16.msra.mxu1 %v1821_v47 }
  0x54   : > { %1690 = vmatpush3.bf16.msra.mxu0 %v1822_v48  ;;  %1611 = vmatprep.subr.bf16.mxu1 %v1867_v1 }
  0x55   : > { %1691 = vmatprep.subr.bf16.mxu0 %v1867_v1 }
  0x57   : > { %1612 = vmatpush3.bf16.msra.mxu1 %v1823_v51 }
  0x58   : > { %1692 = vmatpush3.bf16.msra.mxu0 %v1824_v53  ;;  %1613 = vmatprep.subr.bf16.mxu1 %v1867_v1 }
  0x59   : > { %1693 = vmatprep.subr.bf16.mxu0 %v1867_v1 }
  0x5b   : > { %1614 = vmatpush3.bf16.msra.mxu1 %v1825_v56 }
  0x5c   : > { %1694 = vmatpush3.bf16.msra.mxu0 %v1826_v58  ;;  %1615 = vmatprep.subr.bf16.mxu1 %v1867_v1 }
  0x5d   : > { %1695 = vmatprep.subr.bf16.mxu0 %v1867_v1 }
  0x5f   : > { %1616 = vmatpush3.bf16.msra.mxu1 %v1827_v60 }
  0x60   : > { %1696 = vmatpush3.bf16.msra.mxu0 %v1828_v63  ;;  %1617 = vmatprep.subr.bf16.mxu1 %v1867_v1 }
  0x61   : > { %1697 = vmatprep.subr.bf16.mxu0 %v1867_v1 }
  0x63   : > { %1618 = vmatpush3.bf16.msra.mxu1 %v1829_v3 }
  0x64   : > { %1698 = vmatpush3.bf16.msra.mxu0 %v1830_v6  ;;  %1623 = vmatprep.subr.bf16.mxu1 %v1867_v1 }
  0x65   : > { %1703 = vmatprep.subr.bf16.mxu0 %v1867_v1 }
  0x66   : > { %1620 = vmatmul.mubr.bf16.vlgmr.msra.gmra.mrb[0].mxu1 %v409_v7 }
  0x67   : > { %1624 = vmatpush3.bf16.msra.mxu1 %v1832_v8  ;;  %1700 = vmatmul.mubr.bf16.vlgmr.msra.gmra.mrb[0].mxu0 %v865_v9 }
  0x68   : > { %1704 = vmatpush3.bf16.msra.mxu0 %v1834_v10  ;;  %1625 = vmatprep.subr.bf16.mxu1 %v1867_v1 }
  0x69   : > { %1705 = vmatprep.subr.bf16.mxu0 %v1867_v1  ;;  %1639 = vmatprep.mubr.msk.bf16.mxu1 %vm1868_vm0, %v1867_v1 }
  0x6a   : > { %1719 = vmatprep.mubr.msk.bf16.mxu0 %vm1868_vm0, %v1867_v1 }
  0x6b   : > { %1626 = vmatpush3.bf16.msra.mxu1 %v1835_v11 }
  0x6c   : > { %1706 = vmatpush3.bf16.msra.mxu0 %v1836_v12  ;;  %1627 = vmatprep.subr.bf16.mxu1 %v1867_v1 }
  0x6d   : > { %1707 = vmatprep.subr.bf16.mxu0 %v1867_v1 }
  0x6f   : > { %1628 = vmatpush3.bf16.msra.mxu1 %v1837_v13 }
  0x70   : > { %1708 = vmatpush3.bf16.msra.mxu0 %v1838_v14  ;;  %1629 = vmatprep.subr.bf16.mxu1 %v1867_v1 }
  0x71   : > { %1709 = vmatprep.subr.bf16.mxu0 %v1867_v1 }
  0x73   : > { %1630 = vmatpush3.bf16.msra.mxu1 %v1839_v15 }
  0x74   : > { %1710 = vmatpush3.bf16.msra.mxu0 %v1840_v16  ;;  %1631 = vmatprep.subr.bf16.mxu1 %v1867_v1 }
  0x75   : > { %1711 = vmatprep.subr.bf16.mxu0 %v1867_v1 }
  0x77   : > { %1632 = vmatpush3.bf16.msra.mxu1 %v1841_v17 }
  0x78   : > { %1712 = vmatpush3.bf16.msra.mxu0 %v1842_v18  ;;  %1633 = vmatprep.subr.bf16.mxu1 %v1867_v1 }
  0x79   : > { %1713 = vmatprep.subr.bf16.mxu0 %v1867_v1 }
  0x7b   : > { %1634 = vmatpush3.bf16.msra.mxu1 %v1843_v19 }
  0x7c   : > { %1714 = vmatpush3.bf16.msra.mxu0 %v1844_v21  ;;  %1635 = vmatprep.subr.bf16.mxu1 %v1867_v1 }
  0x7d   : > { %1715 = vmatprep.subr.bf16.mxu0 %v1867_v1 }
  0x7f   : > { %1636 = vmatpush3.bf16.msra.mxu1 %v1845_v22 }
  0x80   : > { %1716 = vmatpush3.bf16.msra.mxu0 %v1846_v25  ;;  %1637 = vmatprep.subr.bf16.mxu1 %v1867_v1 }
  0x81   : > { %1717 = vmatprep.subr.bf16.mxu0 %v1867_v1 }
  0x83   : > { %1638 = vmatpush3.bf16.msra.mxu1 %v1847_v26 }
  0x84   : > { %1718 = vmatpush3.bf16.msra.mxu0 %v1848_v29 }
  0x85   : > { %1723 = vmatprep.subr.bf16.mxu0 %v1867_v1 }
  0x86   : > { %1640 = vmatmul.mubr.bf16.vlgmr.msra.gmra.mrb[0].mxu1 %v1324_v30 }
  0x87   : > { %1720 = vmatmul.mubr.bf16.vlgmr.msra.gmra.mrb[0].mxu0 %v987_v31 }
  0x88   : > { %1724 = vmatpush3.bf16.msra.mxu0 %v1850_v32  ;;  %1739 = vmatprep.mubr.msk.bf16.mxu0 %vm1868_vm0, %v1867_v1 }
  0x89   : > { %1725 = vmatprep.subr.bf16.mxu0 %v1867_v1 }
  0x8c   : > { %1726 = vmatpush3.bf16.msra.mxu0 %v1851_v33 }
  0x8d   : > { %1727 = vmatprep.subr.bf16.mxu0 %v1867_v1 }
  0x90   : > { %1728 = vmatpush3.bf16.msra.mxu0 %v1852_v34 }
  0x91   : > { %1729 = vmatprep.subr.bf16.mxu0 %v1867_v1 }
  0x94   : > { %1730 = vmatpush3.bf16.msra.mxu0 %v1853_v35 }
  0x95   : > { %1731 = vmatprep.subr.bf16.mxu0 %v1867_v1 }
  0x98   : > { %1732 = vmatpush3.bf16.msra.mxu0 %v1854_v36 }
  0x99   : > { %1733 = vmatprep.subr.bf16.mxu0 %v1867_v1 }
  0x9c   : > { %1734 = vmatpush3.bf16.msra.mxu0 %v1855_v37 }
  0x9d   : > { %1735 = vmatprep.subr.bf16.mxu0 %v1867_v1 }
  0xa0   : > { %1736 = vmatpush3.bf16.msra.mxu0 %v1856_v38 }
  0xa1   : > { %1737 = vmatprep.subr.bf16.mxu0 %v1867_v1  ;;  %v1478_v1 = vld [vmem:[%s2250_s2 + $0x1] ss:$0 sm:$0xff] }
  0xa4   : > { %1738 = vmatpush3.bf16.msra.mxu0 %v1857_v39 }
  0xa7   : > { %1740 = vmatmul.mubr.bf16.vlgmr.msra.gmra.mrb[0].mxu0 %v1099_v40 }
 0x159   : > { %v601_v41 = vpop.f32.mrb[0].mxu1 }
 0x15a   : > { %v1641_v42 = vpop.f32.mrb[1].mxu1 }
 0x15b   : > { %v604_v43 = vpop.f32.mrb[2].mxu1 }
 0x15c   : > { %v1642_v44 = vpop.f32.mrb[3].mxu1 }
 0x17a   : > { %v1183_v45 = vpop.f32.mrb[0].mxu0 }
 0x17b   : > { %v1743_v47 = vadd.f32 %v1183_v45, %v601_v41  ;;  %v1741_v48 = vpop.f32.mrb[1].mxu0 }
 0x17c   : > { %v1186_v49 = vpop.f32.mrb[2].mxu0 }
 0x17d   : > { %v1195_v50 = vmul.f32 %v1743_v47, %v1477_v46  ;;  %v1742_v51 = vpop.f32.mrb[3].mxu0 }
 0x17f   : > { %v1201_v52 = vadd.f32 %v1478_v1, %v1195_v50 }
 0x181   : > { %v1202_v53 = vmax.f32 %v1201_v52, 0.0 }
 0x183   : > { %v1203_v54 = vpack.c.bf16 %v1202_v53, %v1202_v53 }
 0x185   : > { %1204 = vst [vmem:[%s168_s23] sm:$0x7] %v1203_v54 }
 0x186 PF: > { %s13_s12 = sadd.s32 1, %s1865_s12  }
 0x187   : > { %p10_p4 = scmp.ge.s32.totalorder %s13_s12, 4  }
 0x189   :  { %12 = sbr.rel (!%p10_p4) target bundleno = 1 (0x1), region = 73 }

// kernel: protonet_forward.2
= control target key start
LH: loop header
LB: loop body
LE: loop exit
PB: predicated region body
PF: predicated region fallthrough
CT: control target
= control target key end

     0   :  { %s3721_s12 = smov 0   ;;  %s4150_s0 = inlined_call_operand.vmem [shape: bf16[2,16,30,32], index: 0, kind: input, shape index: {}]   ;;  %s4151_s1 = inlined_call_operand.vmem [shape: bf16[9,32,128], index: 1, kind: input, shape index: {}]   ;;  %s4152_s2 = inlined_call_operand.vmem [shape: f32[2,128], index: 2, kind: input, shape index: {}]   ;;  %s4153_s3 = inlined_call_operand.vmem [shape: bf16[2,20,128], index: 3, kind: output, shape index: {}]  }
   0x1 LB: > { %s2810_s13 = sadd.s32 4294967295, %s3699_s12   ;;  %p2814_p0 = scmp.ge.s32.totalorder %s3699_s12, 1  ;;  %s3699_s12 = sphi %s3721_s12, %s13_s12  }
   0x2   : > { %p137_p1 = scmp.lt.s32.totalorder %s3699_s12, 3 }
   0x4   : > { %p138_p2 = pnand %p2814_p0, %p137_p1 }
   0x5   : > { %v3732_v0 = vld [vmem:[%s4151_s1 + $0x10] sm:$0xff] (!%p138_p2)   ;;  %p161_p3 = scmp.lt.s32.totalorder (!%p138_p2), %s2810_s13, 1  ;;  %v3737_v1 = vld [vmem:[%s4151_s1 + $0x18] sm:$0xff] (!%p138_p2)   ;;  %v3751_v2 = vld [vmem:[%s4151_s1] sm:$0xff] (!%p138_p2)   ;;  %vm210_vm0 = vcmask (!%p138_p2), 261120   ;;  %vm2666_vm3 = vcmask (!%p138_p2), 1044480  }
   0x6   : > { %141 = sbr.rel (%p138_p2) target bundleno = 446 (0x1be), region = 32  ;;  %3205 = vmatprep.subr.bf16.mxu0 (!%p138_p2), %v3732_v0  ;;  %3277 = vmatprep.subr.bf16.mxu1 (!%p138_p2), %v3732_v0  ;;  %v3762_v4 = vld [vmem:[%s4151_s1 + $0x8] sm:$0xff] (!%p138_p2)   ;;  %v3783_v10 = vld [vmem:[%s4151_s1 + $0x20] sm:$0xff] (!%p138_p2)   ;;  %vm1076_vm1 = vsmask.f32 (!%p138_p2), 7424  ;;  %v3809_v22 = vld [vmem:[%s4151_s1 + $0x30] sm:$0xff] (!%p138_p2)  }
   0x7   : > { %3206 = vmatpush3.bf16.msra.mxu0 (!%p138_p2), %v3732_v0  ;;  %3278 = vmatpush3.bf16.msra.mxu1 (!%p138_p2), %v3732_v0  ;;  %v3798_v18 = vld [vmem:[%s4151_s1 + $0x28] sm:$0xff] (!%p138_p2)   ;;  %v3821_v25 = vld [vmem:[%s4151_s1 + $0x38] sm:$0xff] (!%p138_p2)   ;;  %v3833_v28 = vld [vmem:[%s4151_s1 + $0x40] sm:$0xff] (!%p138_p2)   ;;  %vm1918_vm2 = vsmask.f32 (!%p138_p2), 5376 }
   0x8   : > { %3207 = vmatprep.subr.bf16.mxu0 (!%p138_p2), %v3737_v1  ;;  %3279 = vmatprep.subr.bf16.mxu1 (!%p138_p2), %v3737_v1  ;;  %v3847_v31 = vld [vmem:[%s4151_s1 + $0x48] sm:$0xff] (!%p138_p2)   ;;  %v3860_v36 = vld [vmem:[%s4151_s1 + $0x50] sm:$0xff] (!%p138_p2)   ;;  %v3874_v44 = vld [vmem:[%s4151_s1 + $0x58] sm:$0xff] (!%p138_p2)  }
   0x9   : > { %v3885_v46 = vld [vmem:[%s4151_s1 + $0x60] sm:$0xff] (!%p138_p2)   ;;  %v3897_v49 = vld [vmem:[%s4151_s1 + $0x68] sm:$0xff] (!%p138_p2)   ;;  %v3913_v52 = vld [vmem:[%s4151_s1 + $0x70] sm:$0xff] (!%p138_p2)  }
   0xa   : > { %v3933_v55 = vld [vmem:[%s4151_s1 + $0x78] sm:$0xff] (!%p138_p2)   ;;  %v3949_v60 = vld [vmem:[%s4151_s1 + $0x80] sm:$0xff] (!%p138_p2)  }
   0xb   : > { %3208 = vmatpush3.bf16.msra.mxu0 (!%p138_p2), %v3737_v1  ;;  %3280 = vmatpush3.bf16.msra.mxu1 (!%p138_p2), %v3737_v1 }
   0xc   : > { %3213 = vmatprep.subr.bf16.mxu0 (!%p138_p2), %v3751_v2  ;;  %3285 = vmatprep.subr.bf16.mxu1 (!%p138_p2), %v3751_v2 }
   0xd   : > { %s4155_s13 = smov (!%p161_p3, %s2810_s13), 1 }
   0xe   : > { %s3052_s18 = sshll.u32 %s4155_s13, 8  ;;  %s3621_s6 = smul.u32 12, %s4155_s13 }
   0xf   : > { %s3756_s23 = scalar_lea.vmem %s4150_s0, %s3052_s18 }
  0x10   : > { %v3632_v3 = vld [vmem:[%s3756_s23 + $0x10] sm:$0xff]   ;;  %v3634_v6 = vld [vmem:[%s3756_s23 + $0x18] ss:$0 sps:$4 sm:$0x33]   ;;  %v3638_v7 = vld [vmem:[%s3756_s23] sm:$0xff]   ;;  %s170_s9 = scalar_lea.vmem %s4153_s3, %s3621_s6 }
  0x11   : > { %v3633_v5 = vld [vmem:[%s3756_s23 + $0x30] sm:$0xff]   ;;  %3209 = vmatprep.mubr.msk.bf16.mxu0 %vm210_vm0, %v3632_v3  ;;  %v3636_v8 = vld [vmem:[%s3756_s23 + $0x38] ss:$0 sps:$4 sm:$0x33]   ;;  %v3639_v9 = vld [vmem:[%s3756_s23 + $0x20] sm:$0xff]   ;;  %v1079_v12 = vshll.u32 %v3638_v7, 16 }
  0x12   : > { %3281 = vmatprep.mubr.msk.bf16.mxu1 %vm210_vm0, %v3633_v5  ;;  %3210 = vmatmul.mubr.msk.bf16.vlgmr.msra.gmra.mrb[0].mxu0 %vm210_vm0, %v3634_v6  ;;  %v3644_v11 = vld [vmem:[%s3756_s23 + $0x8] ss:$0 sps:$4 sm:$0x77]   ;;  %v1077_v13 = vshrl.u32 %v3638_v7, 16  ;;  %v3647_v26 = vld [vmem:[%s3756_s23 + $0x40] sm:$0xff]   ;;  %v3653_v32 = vld [vmem:[%s3756_s23 + $0x50] sm:$0xff]  }
  0x13   : > { %3282 = vmatmul.mubr.msk.bf16.vlgmr.msra.gmra.mrb[0].mxu1 %vm210_vm0, %v3636_v8  ;;  %3214 = vmatpush3.bf16.msra.mxu0 %v3751_v2  ;;  %v1084_v14 = vshll.u32 %v3644_v11, 16  ;;  %v3640_v15 = vld [vmem:[%s3756_s23 + $0x8] ss:$0 sps:$4 sm:$0x33]   ;;  %v1081_v16 = vrot.slane %v1079_v12, 1  ;;  %v1088_v23 = vshrl.u32 %v3644_v11, 16 }
  0x14   : > { %3286 = vmatpush3.bf16.msra.mxu1 %v3751_v2  ;;  %3215 = vmatprep.subr.bf16.mxu0 %v3762_v4  ;;  %v3642_v17 = vld [vmem:[%s3756_s23 + $0x28] ss:$0 sps:$4 sm:$0x33]   ;;  %v3648_v27 = vld [vmem:[%s3756_s23 + $0x60] sm:$0xff]   ;;  %v3654_v34 = vld [vmem:[%s3756_s23 + $0x70] sm:$0xff]   ;;  %v1274_v35 = vshll.u32 %v3647_v26, 16 }
  0x15   : > { %3287 = vmatprep.subr.bf16.mxu1 %v3762_v4  ;;  %3217 = vmatprep.mubr.msk.bf16.mxu0 %vm210_vm0, %v3638_v7  ;;  %v1082_v19 = vor.u32 %v1081_v16, %v1077_v13  ;;  %v1086_v20 = vrot.slane %v1084_v14, 1  ;;  %v3649_v29 = vld [vmem:[%s3756_s23 + $0x48] ss:$0 sps:$4 sm:$0x33]   ;;  %v1272_v37 = vshrl.u32 %v3647_v26, 16  ;;  %v3900_v50 = vld [vmem:[%s3756_s23 + $0x80] sm:$0xff]  }
  0x16   : > { %3289 = vmatprep.mubr.msk.bf16.mxu1 %vm210_vm0, %v3639_v9  ;;  %v3651_v30 = vld [vmem:[%s3756_s23 + $0x68] ss:$0 sps:$4 sm:$0x33]   ;;  %v1276_v38 = vrot.slane %v1274_v35, 1  ;;  %v3904_v51 = vld [vmem:[%s3756_s23 + $0xa0] sm:$0xff]   ;;  %v3668_v56 = vld [vmem:[%s3756_s23 + $0x90] sm:$0xff]  }
  0x17   : > { %3216 = vmatpush3.bf16.msra.mxu0 %v3762_v4  ;;  %v1087_v21 = vsel %vm1076_vm1, %v1082_v19, %v1086_v20  ;;  %v1090_v24 = vor.u32 %v1088_v23, %v1086_v20  ;;  %v3659_v33 = vld [vmem:[%s3756_s23 + $0x48] ss:$0 sps:$4 sm:$0x77]   ;;  %v3655_v40 = vld [vmem:[%s3756_s23 + $0x58] ss:$0 sps:$4 sm:$0x33]  }
  0x18   : > { %3288 = vmatpush3.bf16.msra.mxu1 %v3762_v4  ;;  %3221 = vmatprep.subr.bf16.mxu0 %v3783_v10  ;;  %v1279_v39 = vshll.u32 %v3659_v33, 16  ;;  %v3657_v41 = vld [vmem:[%s3756_s23 + $0x78] ss:$0 sps:$4 sm:$0x33]   ;;  %v1277_v42 = vor.u32 %v1276_v38, %v1272_v37  ;;  %v1283_v47 = vshrl.u32 %v3659_v33, 16  ;;  %v3669_v57 = vld [vmem:[%s3756_s23 + $0xb0] sm:$0xff]  }
  0x19   : > { %3293 = vmatprep.subr.bf16.mxu1 %v3783_v10  ;;  %v3925_v53 = vld [vmem:[%s3756_s23 + $0x88] ss:$0 sps:$4 sm:$0x33]   ;;  %v1469_v59 = vshll.u32 %v3900_v50, 16  ;;  %v1467_v61 = vshrl.u32 %v3900_v50, 16  ;;  %v3680_v13 = vld [vmem:[%s3756_s23 + $0xf0] sm:$0xff]  }
  0x1a   : > { %v1281_v43 = vrot.slane %v1279_v39, 1  ;;  %v3928_v54 = vld [vmem:[%s3756_s23 + $0xa8] ss:$0 sps:$4 sm:$0x33]   ;;  %v1904_v16 = vld [vmem:[%s3756_s23] sm:$0xc] }
  0x1b   : > { %v3674_v58 = vld [vmem:[%s3756_s23 + $0x88] ss:$0 sps:$4 sm:$0x77]   ;;  %v1471_v62 = vrot.slane %v1469_v59, 1  ;;  %v3690_v59 = vld [vmem:[%s3756_s23 + $0x30] sm:$0xfc]  }
  0x1c   : > { %v1282_v45 = vsel %vm1076_vm1, %v1277_v42, %v1281_v43  ;;  %v1285_v48 = vor.u32 %v1283_v47, %v1281_v43  ;;  %v1474_v63 = vshll.u32 %v3674_v58, 16  ;;  %v3670_v3 = vld [vmem:[%s3756_s23 + $0x98] ss:$0 sps:$4 sm:$0x33]   ;;  %v3964_v8 = vld [vmem:[%s4151_s1 + $0x88] sm:$0xff]   ;;  %v1478_v11 = vshrl.u32 %v3674_v58, 16 }
  0x1d   : > { %v3672_v5 = vld [vmem:[%s3756_s23 + $0xb8] ss:$0 sps:$4 sm:$0x33]   ;;  %v1472_v6 = vor.u32 %v1471_v62, %v1467_v61  ;;  %v3683_v14 = vld [vmem:[%s3756_s23 + $0xc8] ss:$0 sps:$4 sm:$0x77]  }
  0x1e   : > { %3218 = vmatmul.mubr.msk.bf16.vlgmr.msra.gmra.mrb[0].mxu0 %vm210_vm0, %v3640_v15  ;;  %v1476_v7 = vrot.slane %v1474_v63, 1  ;;  %v2459_v20 = vshll.u32 %v3683_v14, 16  ;;  %v4064_v23 = vld [vmem:[%s3756_s23 + $0x8] sm:$0x1f]   ;;  %v3691_v61 = vld [vmem:[%s3756_s23 + $0x38] sm:$0x1f]  }
  0x1f   : > { %3290 = vmatmul.mubr.msk.bf16.vlgmr.msra.gmra.mrb[0].mxu1 %vm210_vm0, %v3642_v17  ;;  %3222 = vmatpush3.bf16.msra.mxu0 %v3783_v10 }
  0x20   : > { %3294 = vmatpush3.bf16.msra.mxu1 %v3783_v10  ;;  %3223 = vmatprep.subr.bf16.mxu0 %v3798_v18  ;;  %v1480_v12 = vor.u32 %v1478_v11, %v1476_v7  ;;  %v2597_v11 = vshrl.u32 %v3691_v61, 16 }
  0x21   : > { %3295 = vmatprep.subr.bf16.mxu1 %v3798_v18  ;;  %3225 = vmatprep.mubr.msk.bf16.mxu0 %vm210_vm0, %v3639_v9  ;;  %v1477_v9 = vsel %vm1076_vm1, %v1472_v6, %v1476_v7  ;;  %v2589_v7 = vshrl.u32 %v3690_v59, 16 }
  0x22   : > { %3297 = vmatprep.mubr.msk.bf16.mxu1 %vm210_vm0, %v1087_v21  ;;  %v3681_v21 = vld [vmem:[%s3756_s23 + $0xd8] ss:$0 sps:$4 sm:$0x33]  }
  0x23   : > { %3224 = vmatpush3.bf16.msra.mxu0 %v3798_v18 }
  0x24   : > { %3296 = vmatpush3.bf16.msra.mxu1 %v3798_v18  ;;  %3229 = vmatprep.subr.bf16.mxu0 %v3809_v22 }
  0x25   : > { %3301 = vmatprep.subr.bf16.mxu1 %v3809_v22 }
  0x2a   : > { %3226 = vmatmul.mubr.msk.bf16.vlgmr.msra.gmra.mrb[0].mxu0 %vm210_vm0, %v3642_v17  ;;  %v4055_v17 = vld [vmem:[%s3756_s23 + $0x4] sm:$0xf] }
  0x2b   : > { %3298 = vmatmul.mubr.msk.bf16.vlgmr.msra.gmra.mrb[0].mxu1 %vm210_vm0, %v1090_v24  ;;  %3230 = vmatpush3.bf16.msra.mxu0 %v3809_v22  ;;  %v3686_v24 = vld [vmem:[%s3756_s23 + $0x20] sm:$0xfc]  }
  0x2c   : > { %3302 = vmatpush3.bf16.msra.mxu1 %v3809_v22  ;;  %3231 = vmatprep.subr.bf16.mxu0 %v3821_v25  ;;  %v2096_v33 = vshrl.u32 %v3686_v24, 16 }
  0x2d   : > { %3303 = vmatprep.subr.bf16.mxu1 %v3821_v25  ;;  %3233 = vmatprep.mubr.msk.bf16.mxu0 %vm210_vm0, %v3647_v26  ;;  %v3682_v26 = vld [vmem:[%s3756_s23 + $0xf8] ss:$0 sps:$4 sm:$0x33]  }
  0x2e   : > { %3305 = vmatprep.mubr.msk.bf16.mxu1 %vm210_vm0, %v3648_v27  ;;  %v2098_v43 = vrot.slane %v2096_v33, 2 }
  0x2f   : > { %3232 = vmatpush3.bf16.msra.mxu0 %v3821_v25 }
  0x30   : > { %3304 = vmatpush3.bf16.msra.mxu1 %v3821_v25  ;;  %3237 = vmatprep.subr.bf16.mxu0 %v3833_v28 }
  0x31   : > { %3309 = vmatprep.subr.bf16.mxu1 %v3833_v28 }
  0x36   : > { %3234 = vmatmul.mubr.msk.bf16.vlgmr.msra.gmra.mrb[0].mxu0 %vm210_vm0, %v3649_v29 }
  0x37   : > { %3306 = vmatmul.mubr.msk.bf16.vlgmr.msra.gmra.mrb[0].mxu1 %vm210_vm0, %v3651_v30  ;;  %3238 = vmatpush3.bf16.msra.mxu0 %v3833_v28 }
  0x38   : > { %3310 = vmatpush3.bf16.msra.mxu1 %v3833_v28  ;;  %3239 = vmatprep.subr.bf16.mxu0 %v3847_v31 }
  0x39   : > { %3311 = vmatprep.subr.bf16.mxu1 %v3847_v31  ;;  %3241 = vmatprep.mubr.msk.bf16.mxu0 %vm210_vm0, %v3653_v32  ;;  %v1928_v32 = vshrl.u32 %v4064_v23, 16 }
  0x3a   : > { %3313 = vmatprep.mubr.msk.bf16.mxu1 %vm210_vm0, %v3654_v34  ;;  %v2099_v34 = vshll.u32 %v3686_v24, 16  ;;  %v2668_v24 = vrot.slane %v4064_v23, 3 }
  0x3b   : > { %3240 = vmatpush3.bf16.msra.mxu0 %v3847_v31 }
  0x3c   : > { %3312 = vmatpush3.bf16.msra.mxu1 %v3847_v31  ;;  %3245 = vmatprep.subr.bf16.mxu0 %v3860_v36 }
  0x3d   : > { %3317 = vmatprep.subr.bf16.mxu1 %v3860_v36 }
  0x42   : > { %3242 = vmatmul.mubr.msk.bf16.vlgmr.msra.gmra.mrb[0].mxu0 %vm210_vm0, %v3655_v40 }
  0x43   : > { %3314 = vmatmul.mubr.msk.bf16.vlgmr.msra.gmra.mrb[0].mxu1 %vm210_vm0, %v3657_v41  ;;  %3246 = vmatpush3.bf16.msra.mxu0 %v3860_v36  ;;  %v1930_v41 = vrot.slane %v1928_v32, 2 }
  0x44   : > { %3318 = vmatpush3.bf16.msra.mxu1 %v3860_v36  ;;  %3247 = vmatprep.subr.bf16.mxu0 %v3874_v44 }
  0x45   : > { %3319 = vmatprep.subr.bf16.mxu1 %v3874_v44  ;;  %3249 = vmatprep.mubr.msk.bf16.mxu0 %vm210_vm0, %v3648_v27 }
  0x46   : > { %3321 = vmatprep.mubr.msk.bf16.mxu1 %vm210_vm0, %v1282_v45  ;;  %v2101_v45 = vrot.slane %v2099_v34, 3 }
  0x47   : > { %3248 = vmatpush3.bf16.msra.mxu0 %v3874_v44 }
  0x48   : > { %3320 = vmatpush3.bf16.msra.mxu1 %v3874_v44  ;;  %3253 = vmatprep.subr.bf16.mxu0 %v3885_v46 }
  0x49   : > { %3325 = vmatprep.subr.bf16.mxu1 %v3885_v46 }
  0x4e   : > { %3250 = vmatmul.mubr.msk.bf16.vlgmr.msra.gmra.mrb[0].mxu0 %vm210_vm0, %v3651_v30 }
  0x4f   : > { %3322 = vmatmul.mubr.msk.bf16.vlgmr.msra.gmra.mrb[0].mxu1 %vm210_vm0, %v1285_v48  ;;  %3254 = vmatpush3.bf16.msra.mxu0 %v3885_v46  ;;  %v2463_v48 = vshrl.u32 %v3683_v14, 16  ;;  %v2599_v14 = vrot.slane %v2597_v11, 2 }
  0x50   : > { %3326 = vmatpush3.bf16.msra.mxu1 %v3885_v46  ;;  %3255 = vmatprep.subr.bf16.mxu0 %v3897_v49 }
  0x51   : > { %3327 = vmatprep.subr.bf16.mxu1 %v3897_v49  ;;  %3257 = vmatprep.mubr.msk.bf16.mxu0 %vm210_vm0, %v3900_v50 }
  0x52   : > { %3329 = vmatprep.mubr.msk.bf16.mxu1 %vm210_vm0, %v3904_v51 }
  0x53   : > { %3256 = vmatpush3.bf16.msra.mxu0 %v3897_v49 }
  0x54   : > { %3328 = vmatpush3.bf16.msra.mxu1 %v3897_v49  ;;  %3261 = vmatprep.subr.bf16.mxu0 %v3913_v52 }
  0x55   : > { %3333 = vmatprep.subr.bf16.mxu1 %v3913_v52 }
  0x5a   : > { %3258 = vmatmul.mubr.msk.bf16.vlgmr.msra.gmra.mrb[0].mxu0 %vm210_vm0, %v3925_v53 }
  0x5b   : > { %3330 = vmatmul.mubr.msk.bf16.vlgmr.msra.gmra.mrb[0].mxu1 %vm210_vm0, %v3928_v54  ;;  %3262 = vmatpush3.bf16.msra.mxu0 %v3913_v52 }
  0x5c   : > { %3334 = vmatpush3.bf16.msra.mxu1 %v3913_v52  ;;  %3263 = vmatprep.subr.bf16.mxu0 %v3933_v55 }
  0x5d   : > { %3335 = vmatprep.subr.bf16.mxu1 %v3933_v55  ;;  %3265 = vmatprep.mubr.msk.bf16.mxu0 %vm210_vm0, %v3668_v56 }
  0x5e   : > { %3337 = vmatprep.mubr.msk.bf16.mxu1 %vm210_vm0, %v3669_v57 }
  0x5f   : > { %3264 = vmatpush3.bf16.msra.mxu0 %v3933_v55 }
  0x60   : > { %3336 = vmatpush3.bf16.msra.mxu1 %v3933_v55  ;;  %3269 = vmatprep.subr.bf16.mxu0 %v3949_v60 }
  0x61   : > { %3341 = vmatprep.subr.bf16.mxu1 %v3949_v60 }
  0x66   : > { %3266 = vmatmul.mubr.msk.bf16.vlgmr.msra.gmra.mrb[0].mxu0 %vm210_vm0, %v3670_v3 }
  0x67   : > { %3338 = vmatmul.mubr.msk.bf16.vlgmr.msra.gmra.mrb[0].mxu1 %vm210_vm0, %v3672_v5  ;;  %3270 = vmatpush3.bf16.msra.mxu0 %v3949_v60 }
  0x68   : > { %3342 = vmatpush3.bf16.msra.mxu1 %v3949_v60  ;;  %3271 = vmatprep.subr.bf16.mxu0 %v3964_v8 }
  0x69   : > { %3343 = vmatprep.subr.bf16.mxu1 %v3964_v8  ;;  %3273 = vmatprep.mubr.msk.bf16.mxu0 %vm210_vm0, %v3904_v51 }
  0x6a   : > { %3345 = vmatprep.mubr.msk.bf16.mxu1 %vm210_vm0, %v1477_v9 }
  0x6b   : > { %3272 = vmatpush3.bf16.msra.mxu0 %v3964_v8 }
  0x6c   : > { %3344 = vmatpush3.bf16.msra.mxu1 %v3964_v8  ;;  %3349 = vmatprep.subr.bf16.mxu0 %v3732_v0 }
  0x6d   : > { %3421 = vmatprep.subr.bf16.mxu1 %v3732_v0 }
  0x72   : > { %3274 = vmatmul.mubr.msk.bf16.vlgmr.msra.gmra.mrb[0].mxu0 %vm210_vm0, %v3928_v54 }
  0x73   : > { %3346 = vmatmul.mubr.msk.bf16.vlgmr.msra.gmra.mrb[0].mxu1 %vm210_vm0, %v1480_v12  ;;  %3350 = vmatpush3.bf16.msra.mxu0 %v3732_v0 }
  0x74   : > { %3422 = vmatpush3.bf16.msra.mxu1 %v3732_v0  ;;  %3351 = vmatprep.subr.bf16.mxu0 %v3737_v1  ;;  %v3675_v0 = vld [vmem:[%s3756_s23 + $0xc0] sm:$0xff]  }
  0x75   : > { %3423 = vmatprep.subr.bf16.mxu1 %v3737_v1  ;;  %3353 = vmatprep.mubr.msk.bf16.mxu0 %vm210_vm0, %v3668_v56  ;;  %v2454_v15 = vshll.u32 %v3675_v0, 16 }
  0x76   : > { %3425 = vmatprep.mubr.msk.bf16.mxu1 %vm210_vm0, %v3669_v57  ;;  %v3689_v57 = vld [vmem:[%s3756_s23 + $0x18] sm:$0x1f]  }
  0x77   : > { %3352 = vmatpush3.bf16.msra.mxu0 %v3737_v1  ;;  %v2456_v19 = vrot.slane %v2454_v15, 1  ;;  %v2019_v6 = vshll.u32 %v3689_v57, 16 }
  0x78   : > { %3424 = vmatpush3.bf16.msra.mxu1 %v3737_v1  ;;  %3357 = vmatprep.subr.bf16.mxu0 %v3751_v2  ;;  %v3676_v1 = vld [vmem:[%s3756_s23 + $0xe0] sm:$0xff]  }
  0x79   : > { %3429 = vmatprep.subr.bf16.mxu1 %v3751_v2 }
  0x7a   : > { %3354 = vmatmul.mubr.msk.bf16.vlgmr.msra.gmra.mrb[4].mxu0 %vm210_vm0, %v3670_v3 }
  0x7b   : > { %3426 = vmatmul.mubr.msk.bf16.vlgmr.msra.gmra.mrb[4].mxu1 %vm210_vm0, %v3672_v5  ;;  %3358 = vmatpush3.bf16.msra.mxu0 %v3751_v2  ;;  %v2016_v5 = vshrl.u32 %v3689_v57, 16 }
  0x7c   : > { %3430 = vmatpush3.bf16.msra.mxu1 %v3751_v2  ;;  %3359 = vmatprep.subr.bf16.mxu0 %v3762_v4  ;;  %v3677_v2 = vld [vmem:[%s3756_s23 + $0xc8] ss:$0 sps:$4 sm:$0x33]  }
  0x7d   : > { %3431 = vmatprep.subr.bf16.mxu1 %v3762_v4  ;;  %3361 = vmatprep.mubr.msk.bf16.mxu0 %vm210_vm0, %v3900_v50 }
  0x7e   : > { %3433 = vmatprep.mubr.msk.bf16.mxu1 %vm210_vm0, %v3904_v51 }
  0x7f   : > { %3360 = vmatpush3.bf16.msra.mxu0 %v3762_v4 }
  0x80   : > { %3432 = vmatpush3.bf16.msra.mxu1 %v3762_v4  ;;  %3365 = vmatprep.subr.bf16.mxu0 %v3783_v10  ;;  %v4039_v4 = vld [vmem:[%s3756_s23 + $0xe8] ss:$0 sps:$4 sm:$0x33]  }
  0x81   : > { %3437 = vmatprep.subr.bf16.mxu1 %v3783_v10 }
  0x86   : > { %3362 = vmatmul.mubr.msk.bf16.vlgmr.msra.gmra.mrb[4].mxu0 %vm210_vm0, %v3925_v53  ;;  %v3688_v53 = vld [vmem:[%s3756_s23 + $0x10] sm:$0xfc]  }
  0x87   : > { %3434 = vmatmul.mubr.msk.bf16.vlgmr.msra.gmra.mrb[4].mxu1 %vm210_vm0, %v3928_v54  ;;  %3366 = vmatpush3.bf16.msra.mxu0 %v3783_v10  ;;  %v2008_v63 = vshrl.u32 %v3688_v53, 16  ;;  %v2011_v3 = vshll.u32 %v3688_v53, 16 }
  0x88   : > { %3438 = vmatpush3.bf16.msra.mxu1 %v3783_v10  ;;  %3367 = vmatprep.subr.bf16.mxu0 %v3798_v18  ;;  %v3679_v10 = vld [vmem:[%s3756_s23 + $0xd0] sm:$0xff]  }
  0x89   : > { %3439 = vmatprep.subr.bf16.mxu1 %v3798_v18  ;;  %3369 = vmatprep.mubr.msk.bf16.mxu0 %vm210_vm0, %v3904_v51 }
  0x8a   : > { %3441 = vmatprep.mubr.msk.bf16.mxu1 %vm210_vm0, %v1477_v9  ;;  %v2592_v9 = vshll.u32 %v3690_v59, 16 }
  0x8b   : > { %3368 = vmatpush3.bf16.msra.mxu0 %v3798_v18 }
  0x8c   : > { %3440 = vmatpush3.bf16.msra.mxu1 %v3798_v18  ;;  %3373 = vmatprep.subr.bf16.mxu0 %v3809_v22  ;;  %v2452_v18 = vshrl.u32 %v3675_v0, 16 }
  0x8d   : > { %3445 = vmatprep.subr.bf16.mxu1 %v3809_v22 }
  0x8e   : > { %v2457_v27 = vor.u32 %v2456_v19, %v2452_v18 }
  0x92   : > { %3370 = vmatmul.mubr.msk.bf16.vlgmr.msra.gmra.mrb[4].mxu0 %vm210_vm0, %v3928_v54  ;;  %v2102_v54 = vor.u32 %v2101_v45, %v2098_v43 }
  0x93   : > { %3442 = vmatmul.mubr.msk.bf16.vlgmr.msra.gmra.mrb[4].mxu1 %vm210_vm0, %v1480_v12  ;;  %3374 = vmatpush3.bf16.msra.mxu0 %v3809_v22  ;;  %v2600_v12 = vshll.u32 %v3691_v61, 16 }
  0x94   : > { %3446 = vmatpush3.bf16.msra.mxu1 %v3809_v22  ;;  %3375 = vmatprep.subr.bf16.mxu0 %v3821_v25  ;;  %v2995_v22 = vcombine.low %v1904_v16, %v4055_v17 }
  0x95   : > { %3447 = vmatprep.subr.bf16.mxu1 %v3821_v25  ;;  %3377 = vmatprep.mubr.msk.bf16.mxu0 %vm210_vm0, %v3675_v0  ;;  %v2010_v0 = vrot.slane %v2008_v63, 2  ;;  %v2602_v15 = vrot.slane %v2600_v12, 3 }
  0x96   : > { %3449 = vmatprep.mubr.msk.bf16.mxu1 %vm210_vm0, %v3676_v1  ;;  %v1920_v29 = vshrl.u32 %v2995_v22, 16  ;;  %v1923_v30 = vshll.u32 %v2995_v22, 16 }
  0x97   : > { %3376 = vmatpush3.bf16.msra.mxu0 %v3821_v25  ;;  %v2603_v19 = vor.u32 %v2602_v15, %v2599_v14 }
  0x98   : > { %3448 = vmatpush3.bf16.msra.mxu1 %v3821_v25  ;;  %3381 = vmatprep.subr.bf16.mxu0 %v3833_v28  ;;  %v3687_v25 = vld [vmem:[%s3756_s23 + $0x28] sm:$0x1f]   ;;  %v1922_v39 = vrot.slane %v1920_v29, 2  ;;  %v1925_v40 = vrot.slane %v1923_v30, 3 }
  0x99   : > { %3453 = vmatprep.subr.bf16.mxu1 %v3833_v28  ;;  %v2104_v35 = vshrl.u32 %v3687_v25, 16  ;;  %v2107_v37 = vshll.u32 %v3687_v25, 16 }
  0x9a   : > { %v1926_v50 = vor.u32 %v1925_v40, %v1922_v39 }
  0x9b   : > { %v2106_v47 = vrot.slane %v2104_v35, 2 }
  0x9e   : > { %3378 = vmatmul.mubr.msk.bf16.vlgmr.msra.gmra.mrb[4].mxu0 %vm210_vm0, %v3677_v2  ;;  %v2018_v2 = vrot.slane %v2016_v5, 2 }
  0x9f   : > { %3450 = vmatmul.mubr.msk.bf16.vlgmr.msra.gmra.mrb[4].mxu1 %vm210_vm0, %v4039_v4  ;;  %3382 = vmatpush3.bf16.msra.mxu0 %v3833_v28 }
  0xa0   : > { %3454 = vmatpush3.bf16.msra.mxu1 %v3833_v28  ;;  %3383 = vmatprep.subr.bf16.mxu0 %v3847_v31  ;;  %v2461_v28 = vrot.slane %v2459_v20, 1 }
  0xa1   : > { %3455 = vmatprep.subr.bf16.mxu1 %v3847_v31  ;;  %3385 = vmatprep.mubr.msk.bf16.mxu0 %vm210_vm0, %v3679_v10  ;;  %v2591_v10 = vrot.slane %v2589_v7, 2 }
  0xa2   : > { %3457 = vmatprep.mubr.msk.bf16.mxu1 %vm210_vm0, %v3680_v13  ;;  %v2462_v38 = vsel %vm1076_vm1, %v2457_v27, %v2461_v28  ;;  %v2465_v58 = vor.u32 %v2463_v48, %v2461_v28  ;;  %v2594_v13 = vrot.slane %v2592_v9, 3 }
  0xa3   : > { %3384 = vmatpush3.bf16.msra.mxu0 %v3847_v31 }
  0xa4   : > { %3456 = vmatpush3.bf16.msra.mxu1 %v3847_v31  ;;  %3389 = vmatprep.subr.bf16.mxu0 %v3860_v36  ;;  %v1931_v31 = vshll.u32 %v4064_v23, 16  ;;  %v2595_v18 = vor.u32 %v2594_v13, %v2591_v10 }
  0xa5   : > { %3461 = vmatprep.subr.bf16.mxu1 %v3860_v36 }
  0xa6   : > { %v1933_v42 = vrot.slane %v1931_v31, 3 }
  0xa8   : > { %v1934_v51 = vor.u32 %v1933_v42, %v1930_v41 }
  0xaa   : > { %3386 = vmatmul.mubr.msk.bf16.vlgmr.msra.gmra.mrb[4].mxu0 %vm210_vm0, %v3681_v21  ;;  %v1935_v62 = vsel %vm1918_vm2, %v1926_v50, %v1934_v51  ;;  %v2604_v21 = vsel %vm1918_vm2, %v2595_v18, %v2603_v19 }
  0xab   : > { %3458 = vmatmul.mubr.msk.bf16.vlgmr.msra.gmra.mrb[4].mxu1 %vm210_vm0, %v3682_v26  ;;  %3390 = vmatpush3.bf16.msra.mxu0 %v3860_v36 }
  0xac   : > { %3462 = vmatpush3.bf16.msra.mxu1 %v3860_v36  ;;  %3391 = vmatprep.subr.bf16.mxu0 %v3874_v44  ;;  %v2109_v36 = vrot.slane %v2107_v37, 3 }
  0xad   : > { %3463 = vmatprep.subr.bf16.mxu1 %v3874_v44  ;;  %3393 = vmatprep.mubr.msk.bf16.mxu0 %vm210_vm0, %v3676_v1  ;;  %v2013_v1 = vrot.slane %v2011_v3, 3 }
  0xae   : > { %3465 = vmatprep.mubr.msk.bf16.mxu1 %vm210_vm0, %v2462_v38  ;;  %v4085_v56 = vor.u32 %v2109_v36, %v2106_v47 }
  0xaf   : > { %3392 = vmatpush3.bf16.msra.mxu0 %v3874_v44 }
  0xb0   : > { %3464 = vmatpush3.bf16.msra.mxu1 %v3874_v44  ;;  %3397 = vmatprep.subr.bf16.mxu0 %v3885_v46  ;;  %v2111_v44 = vsel %vm1918_vm2, %v2102_v54, %v4085_v56 }
  0xb1   : > { %3469 = vmatprep.subr.bf16.mxu1 %v3885_v46 }
  0xb6   : > { %3394 = vmatmul.mubr.msk.bf16.vlgmr.msra.gmra.mrb[4].mxu0 %vm210_vm0, %v4039_v4  ;;  %v2021_v4 = vrot.slane %v2019_v6, 3 }
  0xb7   : > { %3466 = vmatmul.mubr.msk.bf16.vlgmr.msra.gmra.mrb[4].mxu1 %vm210_vm0, %v2465_v58  ;;  %3398 = vmatpush3.bf16.msra.mxu0 %v3885_v46 }
  0xb8   : > { %3470 = vmatpush3.bf16.msra.mxu1 %v3885_v46  ;;  %3399 = vmatprep.subr.bf16.mxu0 %v3897_v49  ;;  %v2014_v46 = vor.u32 %v2013_v1, %v2010_v0  ;;  %v2022_v16 = vor.u32 %v2021_v4, %v2018_v2 }
  0xb9   : > { %3471 = vmatprep.subr.bf16.mxu1 %v3897_v49  ;;  %3401 = vmatprep.mubr.msk.bf16.mxu0 %vm210_vm0, %v1935_v62 }
  0xba   : > { %3473 = vmatprep.mubr.msk.bf16.mxu1 %vm210_vm0, %v2111_v44  ;;  %v2023_v20 = vsel %vm1918_vm2, %v2014_v46, %v2022_v16 }
  0xbb   : > { %3400 = vmatpush3.bf16.msra.mxu0 %v3897_v49 }
  0xbc   : > { %3472 = vmatpush3.bf16.msra.mxu1 %v3897_v49  ;;  %3405 = vmatprep.subr.bf16.mxu0 %v3913_v52  ;;  %v2662_v49 = vld [vmem:[%s3756_s23] sm:$0x8] }
  0xbd   : > { %3477 = vmatprep.subr.bf16.mxu1 %v3913_v52  ;;  %v3044_v22 = vcombine.low %v2662_v49, %v4055_v17 }
  0xc2   : > { %3402 = vmatmul.mubr.msk.bf16.vlgmr.msra.gmra.mrb[4].mxu0 %vm210_vm0, %v1934_v51 }
  0xc3   : > { %3474 = vmatmul.mubr.msk.bf16.vlgmr.msra.gmra.mrb[4].mxu1 %vm210_vm0, %v4085_v56  ;;  %3406 = vmatpush3.bf16.msra.mxu0 %v3913_v52 }
  0xc4   : > { %3478 = vmatpush3.bf16.msra.mxu1 %v3913_v52  ;;  %3407 = vmatprep.subr.bf16.mxu0 %v3933_v55  ;;  %v2667_v52 = vrot.slane %v3044_v22, 3 }
  0xc5   : > { %3479 = vmatprep.subr.bf16.mxu1 %v3933_v55  ;;  %3409 = vmatprep.mubr.msk.bf16.mxu0 %vm210_vm0, %v2023_v20 }
  0xc6   : > { %3481 = vmatprep.mubr.msk.bf16.mxu1 %vm210_vm0, %v2604_v21  ;;  %v2669_v25 = vsel %vm2666_vm3, %v2667_v52, %v2668_v24 }
  0xc7   : > { %3408 = vmatpush3.bf16.msra.mxu0 %v3933_v55 }
  0xc8   : > { %3480 = vmatpush3.bf16.msra.mxu1 %v3933_v55  ;;  %3413 = vmatprep.subr.bf16.mxu0 %v3949_v60  ;;  %v2928_v55 = vld [vmem:[%s4152_s2] ss:$0 sm:$0xff] }
  0xc9   : > { %3485 = vmatprep.subr.bf16.mxu1 %v3949_v60 }
  0xce   : > { %3410 = vmatmul.mubr.msk.bf16.vlgmr.msra.gmra.mrb[4].mxu0 %vm210_vm0, %v2022_v16 }
  0xcf   : > { %3482 = vmatmul.mubr.msk.bf16.vlgmr.msra.gmra.mrb[4].mxu1 %vm210_vm0, %v2603_v19  ;;  %3414 = vmatpush3.bf16.msra.mxu0 %v3949_v60 }
  0xd0   : > { %3486 = vmatpush3.bf16.msra.mxu1 %v3949_v60  ;;  %3415 = vmatprep.subr.bf16.mxu0 %v3964_v8  ;;  %v2929_v60 = vld [vmem:[%s4152_s2 + $0x1] ss:$0 sm:$0xff] }
  0xd1   : > { %3487 = vmatprep.subr.bf16.mxu1 %v3964_v8  ;;  %3417 = vmatprep.mubr.msk.bf16.mxu0 %vm210_vm0, %v2111_v44 }
  0xd2   : > { %3489 = vmatprep.mubr.msk.bf16.mxu1 %vm210_vm0, %v2669_v25 }
  0xd3   : > { %3416 = vmatpush3.bf16.msra.mxu0 %v3964_v8 }
  0xd4   : > { %3488 = vmatpush3.bf16.msra.mxu1 %v3964_v8 }
  0xda   : > { %3418 = vmatmul.mubr.msk.bf16.vlgmr.msra.gmra.mrb[4].mxu0 %vm210_vm0, %v4085_v56 }
  0xdb   : > { %3490 = vmatmul.mubr.msk.bf16.vlgmr.msra.gmra.mrb[4].mxu1 %vm210_vm0, %v2668_v24 }
 0x145   : > { %v3275_v17 = vpop.f32.mrb[0].mxu0 }
 0x146   : > { %v947_v23 = vmul.f32 %v3275_v17, %v2928_v55  ;;  %v3347_v26 = vpop.f32.mrb[0].mxu1  ;;  %v924_v27 = vpop.f32.mrb[1].mxu0 }
 0x147   : > { %v1540_v28 = vmul.f32 %v3347_v26, %v2928_v55  ;;  %v945_v29 = vmul.f32 %v2928_v55, %v924_v27  ;;  %v1521_v8 = vpop.f32.mrb[1].mxu1  ;;  %v3276_v30 = vpop.f32.mrb[2].mxu0 }
 0x148   : > { %v954_v32 = vadd.f32 %v2929_v60, %v947_v23  ;;  %v1538_v31 = vmul.f32 %v2928_v55, %v1521_v8  ;;  %v3348_v33 = vpop.f32.mrb[2].mxu1  ;;  %v927_v34 = vpop.f32.mrb[3].mxu0 }
 0x149   : > { %v1543_v35 = vadd.f32 %v2929_v60, %v1540_v28  ;;  %v952_v37 = vadd.f32 %v2929_v60, %v945_v29  ;;  %v946_v38 = vmul.f32 %v2928_v55, %v927_v34  ;;  %v1524_v39 = vpop.f32.mrb[3].mxu1 }
 0x14a   : > { %v957_v40 = vmax.f32 %v954_v32, 0.0  ;;  %v1541_v41 = vadd.f32 %v2929_v60, %v1538_v31  ;;  %v1539_v42 = vmul.f32 %v2928_v55, %v1524_v39 }
 0x14b   : > { %v1546_v43 = vmax.f32 %v1543_v35, 0.0  ;;  %v955_v45 = vmax.f32 %v952_v37, 0.0  ;;  %v953_v47 = vadd.f32 %v2929_v60, %v946_v38 }
 0x14c   : > { %v1544_v36 = vmax.f32 %v1541_v41, 0.0  ;;  %v1542_v48 = vadd.f32 %v2929_v60, %v1539_v42 }
 0x14d   : > { %v1549_v50 = vmax.f32 %v957_v40, %v1546_v43  ;;  %v956_v51 = vmax.f32 %v953_v47, 0.0 }
 0x14e   : > { %v1547_v53 = vmax.f32 %v955_v45, %v1544_v36  ;;  %v1545_v54 = vmax.f32 %v1542_v48, 0.0 }
 0x150   : > { %v1548_v56 = vmax.f32 %v956_v51, %v1545_v54 }
 0x1ad   : > { %v3419_v57 = vpop.f32.mrb[4].mxu0 }
 0x1ae   : > { %v2171_v58 = vmul.f32 %v3419_v57, %v2928_v55  ;;  %v3491_v59 = vpop.f32.mrb[4].mxu1  ;;  %v2152_v61 = vpop.f32.mrb[5].mxu0 }
 0x1af   : > { %v2729_v62 = vmul.f32 %v3491_v59, %v2928_v55  ;;  %v2169_v63 = vmul.f32 %v2928_v55, %v2152_v61  ;;  %v2710_v44 = vpop.f32.mrb[5].mxu1  ;;  %v3420_v3 = vpop.f32.mrb[6].mxu0 }
 0x1b0   : > { %v2174_v5 = vadd.f32 %v2929_v60, %v2171_v58  ;;  %v2727_v6 = vmul.f32 %v2928_v55, %v2710_v44  ;;  %v3492_v7 = vpop.f32.mrb[6].mxu1  ;;  %v2155_v9 = vpop.f32.mrb[7].mxu0 }
 0x1b1   : > { %v2732_v11 = vadd.f32 %v2929_v60, %v2729_v62  ;;  %v2172_v12 = vadd.f32 %v2929_v60, %v2169_v63  ;;  %v2170_v0 = vmul.f32 %v2928_v55, %v2155_v9  ;;  %v2713_v1 = vpop.f32.mrb[7].mxu1 }
 0x1b2   : > { %v2177_v2 = vmax.f32 %v2174_v5, 0.0  ;;  %v2730_v4 = vadd.f32 %v2929_v60, %v2727_v6  ;;  %v2728_v10 = vmul.f32 %v2928_v55, %v2713_v1 }
 0x1b3   : > { %v2175_v13 = vmax.f32 %v2172_v12, 0.0  ;;  %v2173_v14 = vadd.f32 %v2929_v60, %v2170_v0  ;;  %v2735_v46 = vmax.f32 %v2732_v11, 0.0 }
 0x1b4   : > { %v2180_v15 = vmax.f32 %v1549_v50, %v2177_v2  ;;  %v2731_v16 = vadd.f32 %v2929_v60, %v2728_v10  ;;  %v2733_v19 = vmax.f32 %v2730_v4, 0.0 }
 0x1b5   : > { %v2178_v18 = vmax.f32 %v1547_v53, %v2175_v13  ;;  %v2176_v20 = vmax.f32 %v2173_v14, 0.0 }
 0x1b6   : > { %v2738_v21 = vmax.f32 %v2180_v15, %v2735_v46  ;;  %v2734_v52 = vmax.f32 %v2731_v16, 0.0 }
 0x1b7   : > { %v2736_v49 = vmax.f32 %v2178_v18, %v2733_v19  ;;  %v2179_v22 = vmax.f32 %v1548_v56, %v2176_v20 }
 0x1b8   : > { %v3055_v24 = vpack.c.bf16 %v2738_v21, %v2738_v21 }
 0x1b9   : > { %v2737_v25 = vmax.f32 %v2179_v22, %v2734_v52 }
 0x1ba   : > { %2754 = vst [vmem:[%s170_s9 + $0x8] sm:$0x3] %v3055_v24 }
 0x1bb   : > { %v3059_v55 = vpack.c.bf16 %v2737_v25, %v2736_v49 }
 0x1bd   : > { %3060 = vst [vmem:[%s170_s9] sm:$0xff] %v3059_v55  }
 0x1be PF: > { %s13_s12 = sadd.s32 1, %s3699_s12  }
 0x1bf   : > { %p10_p4 = scmp.ge.s32.totalorder %s13_s12, 4  }
 0x1c1   :  { %12 = sbr.rel (!%p10_p4) target bundleno = 1 (0x1), region = 85 }

</bundles_post_ra>
